<compile_context>
chip_gen: v7x
topology: tpu7x:2x2x1
jax: 0.10.0
libtpu: 0.0.40
codegen_flags: <defaults>
</compile_context>

<pallas_src>
import math
import jax
import jax.numpy as jnp
from jax import lax
from jax.experimental import pallas as pl
from jax.experimental.pallas import tpu as pltpu

# ---- small shapes consistent with the module (scaled down) ------------------
B = 2            # batch_size
C = 1            # candidates_set_size (hardcoded to 1)
L = 16           # max_len            (512 in the module)
E = 128          # embed_dim          (768 in the module)
H = 128          # hidden_size        (768 in the module)
F = E            # ffn_dim of PositionalWiseFeedForward == embed_dim
VOCAB = 64       # vocab_size         (21128 in the module)
LC = L - 2       # after Conv1d(kernel_size=3), valid padding
T = LC // 3      # after MaxPool1d(kernel_size=3, stride=3)
EPS = 1e-5       # nn.LayerNorm default eps

# ---- packed weight-slab lane offsets (bf16, [E, WN]) -------------------------
WQ_OFF    = 0 * H
WKV_OFF   = 1 * H          # [wk | wv], width 2H
WP_OFF    = 3 * H
W1_OFF    = 4 * H
W2_OFF    = 5 * H
WC_OFF    = 6 * H          # 3 conv taps, width H each
WIH_OFF   = 9 * H          # width 4H
WHH_OFF   = 13 * H         # width 4H
WCLS1_OFF = 17 * H         # width 4H
WN        = 21 * H

# ---- packed bias / vector-slab lane offsets (f32, [1, BN]) -------------------
LNA_G_OFF, LNA_B_OFF = 0 * H, 1 * H
LNC_G_OFF, LNC_B_OFF = 2 * H, 3 * H
BQ_OFF    = 4 * H
BKV_OFF   = 5 * H          # [bk | bv], width 2H
BP_OFF    = 7 * H
B1_OFF    = 8 * H
B2_OFF    = 9 * H
BC_OFF    = 10 * H
BL_OFF    = 11 * H         # width 4H (b_ih + b_hh combined)
BCLS1_OFF = 15 * H         # width 4H
WCLS2_OFF = 19 * H         # width 4H (classifier second Linear row, C == 1)
BCLS2_OFF = 23 * H         # scalar broadcast across one 128-lane segment
BN        = 24 * H


def _layernorm(x, g, b):
    mu = jnp.mean(x, axis=-1, keepdims=True)
    var = jnp.mean((x - mu) ** 2, axis=-1, keepdims=True)
    return (x - mu) * lax.rsqrt(var + EPS) * g + b


def _gelu(x):  # exact (erf) gelu, matching torch.nn.functional.gelu default
    return 0.5 * x * (1.0 + lax.erf(x * 0.7071067811865476))


def _bf16(x):
    return x.astype(jnp.bfloat16)


# ---------------- Pallas kernel: the whole SNet forward ----------------------
# layernorm -> cross-attention -> layernorm -> pointwise FFN + residual ->
# Conv1d(k=3) -> MaxPool1d(3) -> LSTM -> classifier MLP, batched over B.
def snet_kernel(post_ref, refs_ref, pad_ref, w_ref, b_ref, out_ref):
    def W(off, n=H):   # bf16 weight-slab segment (tile-aligned lane slice)
        return w_ref[:, off:off + n]

    def Bv(off, n=H):  # f32 bias / vector slab segment
        return b_ref[:, off:off + n]

    post = post_ref[...].reshape(B * L, E)          # [B*L, E] f32
    refs = refs_ref[...].reshape(B * L, E)          # [B*L, E] f32  (C == 1)
    pad = pad_ref[...]                              # [B, 1, L] 1.0 where pad token

    # atten_layer_norm(post_embedd)
    post_ln = _layernorm(post, Bv(LNA_G_OFF), Bv(LNA_B_OFF))

    # cross_attention projections: q on post, fused [k|v] on refs (bf16 -> MXU)
    q = jnp.dot(_bf16(post_ln), W(WQ_OFF),
                preferred_element_type=jnp.float32) + Bv(BQ_OFF)
    kv = jnp.dot(_bf16(refs), W(WKV_OFF, 2 * H),
                 preferred_element_type=jnp.float32) + Bv(BKV_OFF, 2 * H)
    q3 = q.reshape(B, L, H)
    k3 = kv[:, 0:H].reshape(B, L, H)
    v3 = kv[:, H:2 * H].reshape(B, L, H)

    # att = q @ k^T / sqrt(H); masked_fill(pad, -10000); softmax over keys
    att = jnp.einsum('bqh,bkh->bqk', _bf16(q3), _bf16(k3),
                     preferred_element_type=jnp.float32) * (1.0 / math.sqrt(H))
    att = jnp.where(pad > 0.5, jnp.float32(-10000.0), att)
    att = att - jnp.max(att, axis=-1, keepdims=True)
    ex = jnp.exp(att)
    att = ex * pl.reciprocal(jnp.sum(ex, axis=-1, keepdims=True), approx=True)

    # y = att @ v ; proj
    y = jnp.einsum('bqk,bkh->bqh', _bf16(att), _bf16(v3),
                   preferred_element_type=jnp.float32).reshape(B * L, H)
    y = jnp.dot(_bf16(y), W(WP_OFF),
                preferred_element_type=jnp.float32) + Bv(BP_OFF)

    # con_layer_norm, pointwise FFN (Conv1d k=1 == per-position Linear), residual
    z = _layernorm(y, Bv(LNC_G_OFF), Bv(LNC_B_OFF))
    h1 = _gelu(jnp.dot(_bf16(z), W(W1_OFF),
                       preferred_element_type=jnp.float32) + Bv(B1_OFF))
    fcout = jnp.dot(_bf16(h1), W(W2_OFF),
                    preferred_element_type=jnp.float32) + Bv(B2_OFF)
    u = z + fcout                                    # [B*L, H]

    # Conv1d(H, H, kernel_size=3), valid padding: three full-M (M=B*L) tap
    # matmuls, then per-batch shifted adds (keeps all MXU work batched over B).
    ub = _bf16(u)
    p0 = jnp.dot(ub, W(WC_OFF + 0 * H), preferred_element_type=jnp.float32)
    p1 = jnp.dot(ub, W(WC_OFF + 1 * H), preferred_element_type=jnp.float32)
    p2 = jnp.dot(ub, W(WC_OFF + 2 * H), preferred_element_type=jnp.float32)
    bc = Bv(BC_OFF)
    conv = []                                        # per-batch [LC, H]
    for b in range(B):
        s = b * L
        conv.append(p0[s:s + LC, :] + p1[s + 1:s + 1 + LC, :]
                    + p2[s + 2:s + 2 + LC, :] + bc)

    # MaxPool1d(kernel_size=3, stride=3): pooled rows stacked in (t, b) order so
    # the hoisted input-to-hidden LSTM matmul runs once over the whole sequence.
    xp_rows = []
    for t in range(T):
        for b in range(B):
            xp_rows.append(jnp.max(conv[b][3 * t:3 * t + 3, :],
                                   axis=0, keepdims=True))
    xp = jnp.concatenate(xp_rows, axis=0)            # [T*B, H]
    gx = jnp.dot(_bf16(xp), W(WIH_OFF, 4 * H),
                 preferred_element_type=jnp.float32) + Bv(BL_OFF, 4 * H)

    # LSTM recurrence (gate order i, f, g, o): only h @ whh stays serial.
    whh = W(WHH_OFF, 4 * H)
    h = jnp.zeros((B, H), jnp.float32)
    c = jnp.zeros((B, H), jnp.float32)
    # TODO(synk): at production T (~170) switch to lax.fori_loop (small unroll
    # factor) to bound vreg live ranges; T == 4 here so a static unroll is fine.
    for t in range(T):
        gates = gx[t * B:(t + 1) * B, :] + jnp.dot(
            _bf16(h), whh, preferred_element_type=jnp.float32)
        i_g = jax.nn.sigmoid(gates[:, 0:H])
        f_g = jax.nn.sigmoid(gates[:, H:2 * H])
        g_g = jnp.tanh(gates[:, 2 * H:3 * H])
        o_g = jax.nn.sigmoid(gates[:, 3 * H:4 * H])
        c = f_g * c + i_g * g_g
        h = o_g * jnp.tanh(c)

    # classifier: Linear(C*H, 4H) -> ReLU -> Linear(4H, C), fused here (C == 1).
    hcls = jnp.maximum(
        jnp.dot(_bf16(h), W(WCLS1_OFF, 4 * H),
                preferred_element_type=jnp.float32) + Bv(BCLS1_OFF, 4 * H), 0.0)
    logits = (jnp.sum(hcls * Bv(WCLS2_OFF, 4 * H), axis=-1, keepdims=True)
              + Bv(BCLS2_OFF)[:, 0:1])               # [B, C]
    out_ref[...] = logits


# ---------------- parameters --------------------------------------------------
def init_params(key):
    keys = jax.random.split(key, 24)

    def nrm(i, shape, scale=0.02):
        return (scale * jax.random.normal(keys[i], shape)).astype(jnp.float32)

    emb = nrm(0, (VOCAB, E), 0.1)
    wq = nrm(1, (E, H)); bq = nrm(2, (1, H))
    wk = nrm(3, (E, H)); bk = nrm(4, (1, H))
    wv = nrm(5, (E, H)); bv = nrm(6, (1, H))
    wp = nrm(7, (H, H)); bp = nrm(8, (1, H))
    w1 = nrm(9, (H, F)); b1 = nrm(10, (1, F))        # fc.w1 (Conv1d k=1)
    w2 = nrm(11, (F, H)); b2 = nrm(12, (1, H))       # fc.w2 (Conv1d k=1)
    wc = nrm(13, (3, H, H)); bc = nrm(14, (1, H))    # cnn weight as [tap, in, out]
    wih = nrm(15, (H, 4 * H))                        # LSTM W_ih^T (gates i,f,g,o)
    whh = nrm(16, (H, 4 * H))                        # LSTM W_hh^T
    bl = nrm(17, (1, 4 * H))                         # b_ih + b_hh combined
    wcls1 = nrm(18, (C * H, 4 * H)); bcls1 = nrm(19, (1, 4 * H))
    wcls2 = nrm(20, (C, 4 * H)); bcls2 = nrm(21, (1, C))
    ln_att_g = jnp.ones((1, E), jnp.float32); ln_att_b = jnp.zeros((1, E), jnp.float32)
    ln_con_g = jnp.ones((1, H), jnp.float32); ln_con_b = jnp.zeros((1, H), jnp.float32)

    # All matrices have input dim E == H == 128 -> one bf16 [E, 21H] slab ...
    w_slab = jnp.concatenate(
        [wq, wk, wv, wp, w1, w2, wc[0], wc[1], wc[2], wih, whh, wcls1],
        axis=1).astype(jnp.bfloat16)
    assert w_slab.shape == (E, WN)
    # ... and all row-vectors into one f32 [1, 24H] slab.
    b_slab = jnp.concatenate(
        [ln_att_g, ln_att_b, ln_con_g, ln_con_b,
         bq, bk, bv, bp, b1, b2, bc, bl, bcls1, wcls2,
         jnp.broadcast_to(bcls2, (1, H))], axis=1).astype(jnp.float32)
    assert b_slab.shape == (1, BN)
    return {'emb': emb, 'w_slab': w_slab, 'b_slab': b_slab}


# ---------------- forward wrapper ---------------------------------------------
@jax.jit
def snet_forward(params, post, refs, label):
    # embedding lookups + key-side padding mask (glue, plain JAX gather)
    post_emb = jnp.take(params['emb'], post, axis=0)                        # [B, L, E]
    refs_flat = refs.reshape(B * C, L)
    refs_emb = jnp.take(params['emb'], refs_flat, axis=0).reshape(B, L, E)  # C == 1
    pad = (refs.reshape(B, C, L) == 0).astype(jnp.float32)                  # [B, 1, L]

    vmem = pl.BlockSpec(memory_space=pltpu.MemorySpace.VMEM)
    logits = pl.pallas_call(
        snet_kernel,
        out_shape=jax.ShapeDtypeStruct((B, C), jnp.float32),
        in_specs=[vmem] * 5,
        out_specs=vmem,
    )(post_emb, refs_emb, pad, params['w_slab'], params['b_slab'])

    logits = logits.reshape(B)                  # .squeeze() with C == 1
    y = label.reshape(B).astype(jnp.float32)    # label squeezed to match logits
    # BCEWithLogitsLoss (mean reduction), numerically stable form (glue)
    loss = jnp.mean(jnp.maximum(logits, 0.0) - logits * y
                    + jnp.log1p(jnp.exp(-jnp.abs(logits))))
    return loss, logits


if __name__ == "__main__":
    key = jax.random.PRNGKey(0)
    pkey, k1, k2, k3 = jax.random.split(key, 4)
    params = init_params(pkey)

    post = jax.random.randint(k1, (B, L), 1, VOCAB, dtype=jnp.int32)
    refs = jax.random.randint(k2, (B, C, L), 1, VOCAB, dtype=jnp.int32)
    refs = refs.at[:, :, -4:].set(0)    # a few pad tokens to exercise the attention mask
    label = jax.random.bernoulli(k3, 0.5, (B, C)).astype(jnp.float32)

    loss, logits = snet_forward(params, post, refs, label)
    jax.block_until_ready((loss, logits))
    print("KERNEL_OK")
</pallas_src>

<mosaic_0001>
module attributes {stable_mosaic.version = 11 : i64} {
  func.func @snet_kernel(%arg0: memref<2x16x128xf32, #tpu.memory_space<vmem>>, %arg1: memref<2x16x128xf32, #tpu.memory_space<vmem>>, %arg2: memref<2x1x16xf32, #tpu.memory_space<vmem>>, %arg3: memref<128x2688xbf16, #tpu.memory_space<vmem>>, %arg4: memref<1x3072xf32, #tpu.memory_space<vmem>>, %arg5: memref<2x1xf32, #tpu.memory_space<vmem>>) attributes {dimension_semantics = [], scalar_prefetch = 0 : i64, scratch_operands = 0 : i64, tpu.core_type = #tpu.core_type<tc>} {
    %c0 = arith.constant 0 : index
    %c0_0 = arith.constant 0 : index
    %c0_1 = arith.constant 0 : index
    %0 = vector.load %arg0[%c0, %c0_0, %c0_1] : memref<2x16x128xf32, #tpu.memory_space<vmem>>, vector<2x16x128xf32>
    %1 = vector.shape_cast %0 : vector<2x16x128xf32> to vector<32x128xf32>
    %c0_2 = arith.constant 0 : index
    %c0_3 = arith.constant 0 : index
    %c0_4 = arith.constant 0 : index
    %2 = vector.load %arg1[%c0_2, %c0_3, %c0_4] : memref<2x16x128xf32, #tpu.memory_space<vmem>>, vector<2x16x128xf32>
    %3 = vector.shape_cast %2 : vector<2x16x128xf32> to vector<32x128xf32>
    %c0_5 = arith.constant 0 : index
    %c0_6 = arith.constant 0 : index
    %c0_7 = arith.constant 0 : index
    %4 = vector.load %arg2[%c0_5, %c0_6, %c0_7] : memref<2x1x16xf32, #tpu.memory_space<vmem>>, vector<2x1x16xf32>
    %c0_8 = arith.constant 0 : index
    %c0_9 = arith.constant 0 : index
    %5 = vector.load %arg4[%c0_8, %c0_9] : memref<1x3072xf32, #tpu.memory_space<vmem>>, vector<1x128xf32>
    %c0_10 = arith.constant 0 : index
    %c128 = arith.constant 128 : index
    %6 = vector.load %arg4[%c0_10, %c128] : memref<1x3072xf32, #tpu.memory_space<vmem>>, vector<1x128xf32>
    %cst = arith.constant dense<0.000000e+00> : vector<32xf32>
    %7 = vector.multi_reduction <add>, %1, %cst [1] : vector<32x128xf32> to vector<32xf32>
    %8 = vector.shape_cast %7 : vector<32xf32> to vector<32x1xf32>
    %cst_11 = arith.constant 1.280000e+02 : f32
    %9 = vector.broadcast %cst_11 : f32 to vector<32x1xf32>
    %10 = arith.divf %8, %9 : vector<32x1xf32>
    %11 = vector.broadcast %10 : vector<32x1xf32> to vector<32x128xf32>
    %12 = arith.subf %1, %11 : vector<32x128xf32>
    %13 = arith.mulf %12, %12 : vector<32x128xf32>
    %cst_12 = arith.constant dense<0.000000e+00> : vector<32xf32>
    %14 = vector.multi_reduction <add>, %13, %cst_12 [1] : vector<32x128xf32> to vector<32xf32>
    %15 = vector.shape_cast %14 : vector<32xf32> to vector<32x1xf32>
    %cst_13 = arith.constant 1.280000e+02 : f32
    %16 = vector.broadcast %cst_13 : f32 to vector<32x1xf32>
    %17 = arith.divf %15, %16 : vector<32x1xf32>
    %18 = vector.broadcast %10 : vector<32x1xf32> to vector<32x128xf32>
    %19 = arith.subf %1, %18 : vector<32x128xf32>
    %cst_14 = arith.constant 9.99999974E-6 : f32
    %20 = vector.broadcast %cst_14 : f32 to vector<32x1xf32>
    %21 = arith.addf %17, %20 : vector<32x1xf32>
    %22 = math.rsqrt %21 : vector<32x1xf32>
    %23 = vector.broadcast %22 : vector<32x1xf32> to vector<32x128xf32>
    %24 = arith.mulf %19, %23 : vector<32x128xf32>
    %25 = vector.broadcast %5 : vector<1x128xf32> to vector<32x128xf32>
    %26 = arith.mulf %24, %25 : vector<32x128xf32>
    %27 = vector.broadcast %6 : vector<1x128xf32> to vector<32x128xf32>
    %28 = arith.addf %26, %27 : vector<32x128xf32>
    %29 = arith.truncf %28 : vector<32x128xf32> to vector<32x128xbf16>
    %c0_15 = arith.constant 0 : index
    %c0_16 = arith.constant 0 : index
    %30 = vector.load %arg3[%c0_15, %c0_16] : memref<128x2688xbf16, #tpu.memory_space<vmem>>, vector<128x128xbf16>
    %cst_17 = arith.constant dense<0.000000e+00> : vector<32x128xf32>
    %31 = tpu.matmul %29, %30, %cst_17 {dimension_numbers = #tpu.dot_dimension_numbers<[1], [0], [0], [1], [0, 0, 1, 1], [], []>} : vector<32x128xbf16>, vector<128x128xbf16>, vector<32x128xf32> -> vector<32x128xf32>
    %c0_18 = arith.constant 0 : index
    %c512 = arith.constant 512 : index
    %32 = vector.load %arg4[%c0_18, %c512] : memref<1x3072xf32, #tpu.memory_space<vmem>>, vector<1x128xf32>
    %33 = vector.broadcast %32 : vector<1x128xf32> to vector<32x128xf32>
    %34 = arith.addf %31, %33 : vector<32x128xf32>
    %35 = arith.truncf %3 : vector<32x128xf32> to vector<32x128xbf16>
    %c0_19 = arith.constant 0 : index
    %c128_20 = arith.constant 128 : index
    %36 = vector.load %arg3[%c0_19, %c128_20] : memref<128x2688xbf16, #tpu.memory_space<vmem>>, vector<128x256xbf16>
    %cst_21 = arith.constant dense<0.000000e+00> : vector<32x256xf32>
    %37 = tpu.matmul %35, %36, %cst_21 {dimension_numbers = #tpu.dot_dimension_numbers<[1], [0], [0], [1], [0, 0, 1, 1], [], []>} : vector<32x128xbf16>, vector<128x256xbf16>, vector<32x256xf32> -> vector<32x256xf32>
    %c0_22 = arith.constant 0 : index
    %c640 = arith.constant 640 : index
    %38 = vector.load %arg4[%c0_22, %c640] : memref<1x3072xf32, #tpu.memory_space<vmem>>, vector<1x256xf32>
    %39 = vector.broadcast %38 : vector<1x256xf32> to vector<32x256xf32>
    %40 = arith.addf %37, %39 : vector<32x256xf32>
    %41 = vector.shape_cast %34 : vector<32x128xf32> to vector<2x16x128xf32>
    %42 = vector.extract_strided_slice %40 {offsets = [0, 0], sizes = [32, 128], strides = [1, 1]} : vector<32x256xf32> to vector<32x128xf32>
    %43 = vector.shape_cast %42 : vector<32x128xf32> to vector<2x16x128xf32>
    %44 = vector.extract_strided_slice %40 {offsets = [0, 128], sizes = [32, 128], strides = [1, 1]} : vector<32x256xf32> to vector<32x128xf32>
    %45 = vector.shape_cast %44 : vector<32x128xf32> to vector<2x16x128xf32>
    %46 = arith.truncf %41 : vector<2x16x128xf32> to vector<2x16x128xbf16>
    %47 = arith.truncf %43 : vector<2x16x128xf32> to vector<2x16x128xbf16>
    "tpu.trace_start"() <{level = 10 : i32, message = "bqh,bkh->bqk"}> : () -> ()
    %cst_23 = arith.constant dense<0.000000e+00> : vector<2x16x16xf32>
    %48 = tpu.matmul %46, %47, %cst_23 {dimension_numbers = #tpu.dot_dimension_numbers<[2], [2], [1], [1], [0, 0, 0, 1, 1, 1], [0], [0]>} : vector<2x16x128xbf16>, vector<2x16x128xbf16>, vector<2x16x16xf32> -> vector<2x16x16xf32>
    "tpu.trace_stop"() : () -> ()
    %cst_24 = arith.constant 0.0883883461 : f32
    %49 = vector.broadcast %cst_24 : f32 to vector<2x16x16xf32>
    %50 = arith.mulf %48, %49 : vector<2x16x16xf32>
    %cst_25 = arith.constant 5.000000e-01 : f32
    %51 = vector.broadcast %cst_25 : f32 to vector<2x1x16xf32>
    %52 = arith.cmpf ogt, %4, %51 : vector<2x1x16xf32>
    %cst_26 = arith.constant -1.000000e+04 : f32
    %53 = vector.shape_cast %52 : vector<2x1x16xi1> to vector<2x1x16xi1>
    %54 = vector.broadcast %53 : vector<2x1x16xi1> to vector<2x16x16xi1>
    %55 = vector.broadcast %cst_26 : f32 to vector<2x16x16xf32>
    %56 = arith.select %54, %55, %50 : vector<2x16x16xi1>, vector<2x16x16xf32>
    %cst_27 = arith.constant dense<0xFF800000> : vector<2x16xf32>
    %57 = vector.multi_reduction <maximumf>, %56, %cst_27 [2] : vector<2x16x16xf32> to vector<2x16xf32>
    %58 = vector.shape_cast %57 : vector<2x16xf32> to vector<2x16x1xf32>
    %59 = vector.broadcast %58 : vector<2x16x1xf32> to vector<2x16x16xf32>
    %60 = arith.subf %56, %59 : vector<2x16x16xf32>
    %61 = math.exp %60 : vector<2x16x16xf32>
    %cst_28 = arith.constant dense<0.000000e+00> : vector<2x16xf32>
    %62 = vector.multi_reduction <add>, %61, %cst_28 [2] : vector<2x16x16xf32> to vector<2x16xf32>
    %63 = vector.shape_cast %62 : vector<2x16xf32> to vector<2x16x1xf32>
    %64 = tpu.reciprocal %63 {approx = true} : vector<2x16x1xf32> -> vector<2x16x1xf32>
    %65 = vector.broadcast %64 : vector<2x16x1xf32> to vector<2x16x16xf32>
    %66 = arith.mulf %61, %65 : vector<2x16x16xf32>
    %67 = arith.truncf %66 : vector<2x16x16xf32> to vector<2x16x16xbf16>
    %68 = arith.truncf %45 : vector<2x16x128xf32> to vector<2x16x128xbf16>
    "tpu.trace_start"() <{level = 10 : i32, message = "bqk,bkh->bqh"}> : () -> ()
    %cst_29 = arith.constant dense<0.000000e+00> : vector<2x16x128xf32>
    %69 = tpu.matmul %67, %68, %cst_29 {dimension_numbers = #tpu.dot_dimension_numbers<[2], [1], [1], [2], [0, 0, 0, 1, 1, 2], [0], [0]>} : vector<2x16x16xbf16>, vector<2x16x128xbf16>, vector<2x16x128xf32> -> vector<2x16x128xf32>
    "tpu.trace_stop"() : () -> ()
    %70 = vector.shape_cast %69 : vector<2x16x128xf32> to vector<32x128xf32>
    %71 = arith.truncf %70 : vector<32x128xf32> to vector<32x128xbf16>
    %c0_30 = arith.constant 0 : index
    %c384 = arith.constant 384 : index
    %72 = vector.load %arg3[%c0_30, %c384] : memref<128x2688xbf16, #tpu.memory_space<vmem>>, vector<128x128xbf16>
    %cst_31 = arith.constant dense<0.000000e+00> : vector<32x128xf32>
    %73 = tpu.matmul %71, %72, %cst_31 {dimension_numbers = #tpu.dot_dimension_numbers<[1], [0], [0], [1], [0, 0, 1, 1], [], []>} : vector<32x128xbf16>, vector<128x128xbf16>, vector<32x128xf32> -> vector<32x128xf32>
    %c0_32 = arith.constant 0 : index
    %c896 = arith.constant 896 : index
    %74 = vector.load %arg4[%c0_32, %c896] : memref<1x3072xf32, #tpu.memory_space<vmem>>, vector<1x128xf32>
    %75 = vector.broadcast %74 : vector<1x128xf32> to vector<32x128xf32>
    %76 = arith.addf %73, %75 : vector<32x128xf32>
    %c0_33 = arith.constant 0 : index
    %c256 = arith.constant 256 : index
    %77 = vector.load %arg4[%c0_33, %c256] : memref<1x3072xf32, #tpu.memory_space<vmem>>, vector<1x128xf32>
    %c0_34 = arith.constant 0 : index
    %c384_35 = arith.constant 384 : index
    %78 = vector.load %arg4[%c0_34, %c384_35] : memref<1x3072xf32, #tpu.memory_space<vmem>>, vector<1x128xf32>
    %cst_36 = arith.constant dense<0.000000e+00> : vector<32xf32>
    %79 = vector.multi_reduction <add>, %76, %cst_36 [1] : vector<32x128xf32> to vector<32xf32>
    %80 = vector.shape_cast %79 : vector<32xf32> to vector<32x1xf32>
    %cst_37 = arith.constant 1.280000e+02 : f32
    %81 = vector.broadcast %cst_37 : f32 to vector<32x1xf32>
    %82 = arith.divf %80, %81 : vector<32x1xf32>
    %83 = vector.broadcast %82 : vector<32x1xf32> to vector<32x128xf32>
    %84 = arith.subf %76, %83 : vector<32x128xf32>
    %85 = arith.mulf %84, %84 : vector<32x128xf32>
    %cst_38 = arith.constant dense<0.000000e+00> : vector<32xf32>
    %86 = vector.multi_reduction <add>, %85, %cst_38 [1] : vector<32x128xf32> to vector<32xf32>
    %87 = vector.shape_cast %86 : vector<32xf32> to vector<32x1xf32>
    %cst_39 = arith.constant 1.280000e+02 : f32
    %88 = vector.broadcast %cst_39 : f32 to vector<32x1xf32>
    %89 = arith.divf %87, %88 : vector<32x1xf32>
    %90 = vector.broadcast %82 : vector<32x1xf32> to vector<32x128xf32>
    %91 = arith.subf %76, %90 : vector<32x128xf32>
    %cst_40 = arith.constant 9.99999974E-6 : f32
    %92 = vector.broadcast %cst_40 : f32 to vector<32x1xf32>
    %93 = arith.addf %89, %92 : vector<32x1xf32>
    %94 = math.rsqrt %93 : vector<32x1xf32>
    %95 = vector.broadcast %94 : vector<32x1xf32> to vector<32x128xf32>
    %96 = arith.mulf %91, %95 : vector<32x128xf32>
    %97 = vector.broadcast %77 : vector<1x128xf32> to vector<32x128xf32>
    %98 = arith.mulf %96, %97 : vector<32x128xf32>
    %99 = vector.broadcast %78 : vector<1x128xf32> to vector<32x128xf32>
    %100 = arith.addf %98, %99 : vector<32x128xf32>
    %101 = arith.truncf %100 : vector<32x128xf32> to vector<32x128xbf16>
    %c0_41 = arith.constant 0 : index
    %c512_42 = arith.constant 512 : index
    %102 = vector.load %arg3[%c0_41, %c512_42] : memref<128x2688xbf16, #tpu.memory_space<vmem>>, vector<128x128xbf16>
    %cst_43 = arith.constant dense<0.000000e+00> : vector<32x128xf32>
    %103 = tpu.matmul %101, %102, %cst_43 {dimension_numbers = #tpu.dot_dimension_numbers<[1], [0], [0], [1], [0, 0, 1, 1], [], []>} : vector<32x128xbf16>, vector<128x128xbf16>, vector<32x128xf32> -> vector<32x128xf32>
    %c0_44 = arith.constant 0 : index
    %c1024 = arith.constant 1024 : index
    %104 = vector.load %arg4[%c0_44, %c1024] : memref<1x3072xf32, #tpu.memory_space<vmem>>, vector<1x128xf32>
    %105 = vector.broadcast %104 : vector<1x128xf32> to vector<32x128xf32>
    %106 = arith.addf %103, %105 : vector<32x128xf32>
    %cst_45 = arith.constant 5.000000e-01 : f32
    %107 = vector.broadcast %cst_45 : f32 to vector<32x128xf32>
    %108 = arith.mulf %107, %106 : vector<32x128xf32>
    %cst_46 = arith.constant 0.707106769 : f32
    %109 = vector.broadcast %cst_46 : f32 to vector<32x128xf32>
    %110 = arith.mulf %106, %109 : vector<32x128xf32>
    %111 = math.erf %110 : vector<32x128xf32>
    %cst_47 = arith.constant 1.000000e+00 : f32
    %112 = vector.broadcast %cst_47 : f32 to vector<32x128xf32>
    %113 = arith.addf %112, %111 : vector<32x128xf32>
    %114 = arith.mulf %108, %113 : vector<32x128xf32>
    %115 = arith.truncf %114 : vector<32x128xf32> to vector<32x128xbf16>
    %c0_48 = arith.constant 0 : index
    %c640_49 = arith.constant 640 : index
    %116 = vector.load %arg3[%c0_48, %c640_49] : memref<128x2688xbf16, #tpu.memory_space<vmem>>, vector<128x128xbf16>
    %cst_50 = arith.constant dense<0.000000e+00> : vector<32x128xf32>
    %117 = tpu.matmul %115, %116, %cst_50 {dimension_numbers = #tpu.dot_dimension_numbers<[1], [0], [0], [1], [0, 0, 1, 1], [], []>} : vector<32x128xbf16>, vector<128x128xbf16>, vector<32x128xf32> -> vector<32x128xf32>
    %c0_51 = arith.constant 0 : index
    %c1152 = arith.constant 1152 : index
    %118 = vector.load %arg4[%c0_51, %c1152] : memref<1x3072xf32, #tpu.memory_space<vmem>>, vector<1x128xf32>
    %119 = vector.broadcast %118 : vector<1x128xf32> to vector<32x128xf32>
    %120 = arith.addf %117, %119 : vector<32x128xf32>
    %121 = arith.addf %100, %120 : vector<32x128xf32>
    %122 = arith.truncf %121 : vector<32x128xf32> to vector<32x128xbf16>
    %c0_52 = arith.constant 0 : index
    %c768 = arith.constant 768 : index
    %123 = vector.load %arg3[%c0_52, %c768] : memref<128x2688xbf16, #tpu.memory_space<vmem>>, vector<128x128xbf16>
    %cst_53 = arith.constant dense<0.000000e+00> : vector<32x128xf32>
    %124 = tpu.matmul %122, %123, %cst_53 {dimension_numbers = #tpu.dot_dimension_numbers<[1], [0], [0], [1], [0, 0, 1, 1], [], []>} : vector<32x128xbf16>, vector<128x128xbf16>, vector<32x128xf32> -> vector<32x128xf32>
    %c0_54 = arith.constant 0 : index
    %c896_55 = arith.constant 896 : index
    %125 = vector.load %arg3[%c0_54, %c896_55] : memref<128x2688xbf16, #tpu.memory_space<vmem>>, vector<128x128xbf16>
    %cst_56 = arith.constant dense<0.000000e+00> : vector<32x128xf32>
    %126 = tpu.matmul %122, %125, %cst_56 {dimension_numbers = #tpu.dot_dimension_numbers<[1], [0], [0], [1], [0, 0, 1, 1], [], []>} : vector<32x128xbf16>, vector<128x128xbf16>, vector<32x128xf32> -> vector<32x128xf32>
    %c0_57 = arith.constant 0 : index
    %c1024_58 = arith.constant 1024 : index
    %127 = vector.load %arg3[%c0_57, %c1024_58] : memref<128x2688xbf16, #tpu.memory_space<vmem>>, vector<128x128xbf16>
    %cst_59 = arith.constant dense<0.000000e+00> : vector<32x128xf32>
    %128 = tpu.matmul %122, %127, %cst_59 {dimension_numbers = #tpu.dot_dimension_numbers<[1], [0], [0], [1], [0, 0, 1, 1], [], []>} : vector<32x128xbf16>, vector<128x128xbf16>, vector<32x128xf32> -> vector<32x128xf32>
    %c0_60 = arith.constant 0 : index
    %c1280 = arith.constant 1280 : index
    %129 = vector.load %arg4[%c0_60, %c1280] : memref<1x3072xf32, #tpu.memory_space<vmem>>, vector<1x128xf32>
    %130 = vector.extract_strided_slice %124 {offsets = [0, 0], sizes = [14, 128], strides = [1, 1]} : vector<32x128xf32> to vector<14x128xf32>
    %131 = vector.extract_strided_slice %126 {offsets = [1, 0], sizes = [14, 128], strides = [1, 1]} : vector<32x128xf32> to vector<14x128xf32>
    %132 = arith.addf %130, %131 : vector<14x128xf32>
    %133 = vector.extract_strided_slice %128 {offsets = [2, 0], sizes = [14, 128], strides = [1, 1]} : vector<32x128xf32> to vector<14x128xf32>
    %134 = arith.addf %132, %133 : vector<14x128xf32>
    %135 = vector.broadcast %129 : vector<1x128xf32> to vector<14x128xf32>
    %136 = arith.addf %134, %135 : vector<14x128xf32>
    %137 = vector.extract_strided_slice %124 {offsets = [16, 0], sizes = [14, 128], strides = [1, 1]} : vector<32x128xf32> to vector<14x128xf32>
    %138 = vector.extract_strided_slice %126 {offsets = [17, 0], sizes = [14, 128], strides = [1, 1]} : vector<32x128xf32> to vector<14x128xf32>
    %139 = arith.addf %137, %138 : vector<14x128xf32>
    %140 = vector.extract_strided_slice %128 {offsets = [18, 0], sizes = [14, 128], strides = [1, 1]} : vector<32x128xf32> to vector<14x128xf32>
    %141 = arith.addf %139, %140 : vector<14x128xf32>
    %142 = vector.broadcast %129 : vector<1x128xf32> to vector<14x128xf32>
    %143 = arith.addf %141, %142 : vector<14x128xf32>
    %144 = vector.extract_strided_slice %136 {offsets = [0, 0], sizes = [3, 128], strides = [1, 1]} : vector<14x128xf32> to vector<3x128xf32>
    %cst_61 = arith.constant dense<0xFF800000> : vector<128xf32>
    %145 = vector.multi_reduction <maximumf>, %144, %cst_61 [0] : vector<3x128xf32> to vector<128xf32>
    %146 = vector.shape_cast %145 : vector<128xf32> to vector<1x128xf32>
    %147 = vector.extract_strided_slice %143 {offsets = [0, 0], sizes = [3, 128], strides = [1, 1]} : vector<14x128xf32> to vector<3x128xf32>
    %cst_62 = arith.constant dense<0xFF800000> : vector<128xf32>
    %148 = vector.multi_reduction <maximumf>, %147, %cst_62 [0] : vector<3x128xf32> to vector<128xf32>
    %149 = vector.shape_cast %148 : vector<128xf32> to vector<1x128xf32>
    %150 = vector.extract_strided_slice %136 {offsets = [3, 0], sizes = [3, 128], strides = [1, 1]} : vector<14x128xf32> to vector<3x128xf32>
    %cst_63 = arith.constant dense<0xFF800000> : vector<128xf32>
    %151 = vector.multi_reduction <maximumf>, %150, %cst_63 [0] : vector<3x128xf32> to vector<128xf32>
    %152 = vector.shape_cast %151 : vector<128xf32> to vector<1x128xf32>
    %153 = vector.extract_strided_slice %143 {offsets = [3, 0], sizes = [3, 128], strides = [1, 1]} : vector<14x128xf32> to vector<3x128xf32>
    %cst_64 = arith.constant dense<0xFF800000> : vector<128xf32>
    %154 = vector.multi_reduction <maximumf>, %153, %cst_64 [0] : vector<3x128xf32> to vector<128xf32>
    %155 = vector.shape_cast %154 : vector<128xf32> to vector<1x128xf32>
    %156 = vector.extract_strided_slice %136 {offsets = [6, 0], sizes = [3, 128], strides = [1, 1]} : vector<14x128xf32> to vector<3x128xf32>
    %cst_65 = arith.constant dense<0xFF800000> : vector<128xf32>
    %157 = vector.multi_reduction <maximumf>, %156, %cst_65 [0] : vector<3x128xf32> to vector<128xf32>
    %158 = vector.shape_cast %157 : vector<128xf32> to vector<1x128xf32>
    %159 = vector.extract_strided_slice %143 {offsets = [6, 0], sizes = [3, 128], strides = [1, 1]} : vector<14x128xf32> to vector<3x128xf32>
    %cst_66 = arith.constant dense<0xFF800000> : vector<128xf32>
    %160 = vector.multi_reduction <maximumf>, %159, %cst_66 [0] : vector<3x128xf32> to vector<128xf32>
    %161 = vector.shape_cast %160 : vector<128xf32> to vector<1x128xf32>
    %162 = vector.extract_strided_slice %136 {offsets = [9, 0], sizes = [3, 128], strides = [1, 1]} : vector<14x128xf32> to vector<3x128xf32>
    %cst_67 = arith.constant dense<0xFF800000> : vector<128xf32>
    %163 = vector.multi_reduction <maximumf>, %162, %cst_67 [0] : vector<3x128xf32> to vector<128xf32>
    %164 = vector.shape_cast %163 : vector<128xf32> to vector<1x128xf32>
    %165 = vector.extract_strided_slice %143 {offsets = [9, 0], sizes = [3, 128], strides = [1, 1]} : vector<14x128xf32> to vector<3x128xf32>
    %cst_68 = arith.constant dense<0xFF800000> : vector<128xf32>
    %166 = vector.multi_reduction <maximumf>, %165, %cst_68 [0] : vector<3x128xf32> to vector<128xf32>
    %167 = vector.shape_cast %166 : vector<128xf32> to vector<1x128xf32>
    %168 = tpu.concatenate %146, %149, %152, %155, %158, %161, %164, %167 in 0 : vector<1x128xf32>, vector<1x128xf32>, vector<1x128xf32>, vector<1x128xf32>, vector<1x128xf32>, vector<1x128xf32>, vector<1x128xf32>, vector<1x128xf32> -> vector<8x128xf32>
    %169 = arith.truncf %168 : vector<8x128xf32> to vector<8x128xbf16>
    %c0_69 = arith.constant 0 : index
    %c1152_70 = arith.constant 1152 : index
    %170 = vector.load %arg3[%c0_69, %c1152_70] : memref<128x2688xbf16, #tpu.memory_space<vmem>>, vector<128x512xbf16>
    %cst_71 = arith.constant dense<0.000000e+00> : vector<8x512xf32>
    %171 = tpu.matmul %169, %170, %cst_71 {dimension_numbers = #tpu.dot_dimension_numbers<[1], [0], [0], [1], [0, 0, 1, 1], [], []>} : vector<8x128xbf16>, vector<128x512xbf16>, vector<8x512xf32> -> vector<8x512xf32>
    %c0_72 = arith.constant 0 : index
    %c1408 = arith.constant 1408 : index
    %172 = vector.load %arg4[%c0_72, %c1408] : memref<1x3072xf32, #tpu.memory_space<vmem>>, vector<1x512xf32>
    %173 = vector.broadcast %172 : vector<1x512xf32> to vector<8x512xf32>
    %174 = arith.addf %171, %173 : vector<8x512xf32>
    %c0_73 = arith.constant 0 : index
    %c1664 = arith.constant 1664 : index
    %175 = vector.load %arg3[%c0_73, %c1664] : memref<128x2688xbf16, #tpu.memory_space<vmem>>, vector<128x512xbf16>
    %cst_74 = arith.constant 0.000000e+00 : f32
    %176 = vector.broadcast %cst_74 : f32 to vector<2x128xf32>
    %cst_75 = arith.constant 0.000000e+00 : f32
    %177 = vector.broadcast %cst_75 : f32 to vector<2x128xf32>
    %178 = vector.extract_strided_slice %174 {offsets = [0, 0], sizes = [2, 512], strides = [1, 1]} : vector<8x512xf32> to vector<2x512xf32>
    %179 = arith.truncf %176 : vector<2x128xf32> to vector<2x128xbf16>
    %cst_76 = arith.constant dense<0.000000e+00> : vector<2x512xf32>
    %180 = tpu.matmul %179, %175, %cst_76 {dimension_numbers = #tpu.dot_dimension_numbers<[1], [0], [0], [1], [0, 0, 1, 1], [], []>} : vector<2x128xbf16>, vector<128x512xbf16>, vector<2x512xf32> -> vector<2x512xf32>
    %181 = arith.addf %178, %180 : vector<2x512xf32>
    %182 = vector.extract_strided_slice %181 {offsets = [0, 0], sizes = [2, 128], strides = [1, 1]} : vector<2x512xf32> to vector<2x128xf32>
    %183 = arith.negf %182 : vector<2x128xf32>
    %184 = math.exp %183 : vector<2x128xf32>
    %cst_77 = arith.constant 1.000000e+00 : f32
    %185 = vector.broadcast %cst_77 : f32 to vector<2x128xf32>
    %186 = arith.addf %185, %184 : vector<2x128xf32>
    %187 = arith.divf %185, %186 : vector<2x128xf32>
    %188 = vector.extract_strided_slice %181 {offsets = [0, 128], sizes = [2, 128], strides = [1, 1]} : vector<2x512xf32> to vector<2x128xf32>
    %189 = arith.negf %188 : vector<2x128xf32>
    %190 = math.exp %189 : vector<2x128xf32>
    %cst_78 = arith.constant 1.000000e+00 : f32
    %191 = vector.broadcast %cst_78 : f32 to vector<2x128xf32>
    %192 = arith.addf %191, %190 : vector<2x128xf32>
    %193 = arith.divf %191, %192 : vector<2x128xf32>
    %194 = vector.extract_strided_slice %181 {offsets = [0, 256], sizes = [2, 128], strides = [1, 1]} : vector<2x512xf32> to vector<2x128xf32>
    %195 = math.tanh %194 : vector<2x128xf32>
    %196 = vector.extract_strided_slice %181 {offsets = [0, 384], sizes = [2, 128], strides = [1, 1]} : vector<2x512xf32> to vector<2x128xf32>
    %197 = arith.negf %196 : vector<2x128xf32>
    %198 = math.exp %197 : vector<2x128xf32>
    %cst_79 = arith.constant 1.000000e+00 : f32
    %199 = vector.broadcast %cst_79 : f32 to vector<2x128xf32>
    %200 = arith.addf %199, %198 : vector<2x128xf32>
    %201 = arith.divf %199, %200 : vector<2x128xf32>
    %202 = arith.mulf %193, %177 : vector<2x128xf32>
    %203 = arith.mulf %187, %195 : vector<2x128xf32>
    %204 = arith.addf %202, %203 : vector<2x128xf32>
    %205 = math.tanh %204 : vector<2x128xf32>
    %206 = arith.mulf %201, %205 : vector<2x128xf32>
    %207 = vector.extract_strided_slice %174 {offsets = [2, 0], sizes = [2, 512], strides = [1, 1]} : vector<8x512xf32> to vector<2x512xf32>
    %208 = arith.truncf %206 : vector<2x128xf32> to vector<2x128xbf16>
    %cst_80 = arith.constant dense<0.000000e+00> : vector<2x512xf32>
    %209 = tpu.matmul %208, %175, %cst_80 {dimension_numbers = #tpu.dot_dimension_numbers<[1], [0], [0], [1], [0, 0, 1, 1], [], []>} : vector<2x128xbf16>, vector<128x512xbf16>, vector<2x512xf32> -> vector<2x512xf32>
    %210 = arith.addf %207, %209 : vector<2x512xf32>
    %211 = vector.extract_strided_slice %210 {offsets = [0, 0], sizes = [2, 128], strides = [1, 1]} : vector<2x512xf32> to vector<2x128xf32>
    %212 = arith.negf %211 : vector<2x128xf32>
    %213 = math.exp %212 : vector<2x128xf32>
    %cst_81 = arith.constant 1.000000e+00 : f32
    %214 = vector.broadcast %cst_81 : f32 to vector<2x128xf32>
    %215 = arith.addf %214, %213 : vector<2x128xf32>
    %216 = arith.divf %214, %215 : vector<2x128xf32>
    %217 = vector.extract_strided_slice %210 {offsets = [0, 128], sizes = [2, 128], strides = [1, 1]} : vector<2x512xf32> to vector<2x128xf32>
    %218 = arith.negf %217 : vector<2x128xf32>
    %219 = math.exp %218 : vector<2x128xf32>
    %cst_82 = arith.constant 1.000000e+00 : f32
    %220 = vector.broadcast %cst_82 : f32 to vector<2x128xf32>
    %221 = arith.addf %220, %219 : vector<2x128xf32>
    %222 = arith.divf %220, %221 : vector<2x128xf32>
    %223 = vector.extract_strided_slice %210 {offsets = [0, 256], sizes = [2, 128], strides = [1, 1]} : vector<2x512xf32> to vector<2x128xf32>
    %224 = math.tanh %223 : vector<2x128xf32>
    %225 = vector.extract_strided_slice %210 {offsets = [0, 384], sizes = [2, 128], strides = [1, 1]} : vector<2x512xf32> to vector<2x128xf32>
    %226 = arith.negf %225 : vector<2x128xf32>
    %227 = math.exp %226 : vector<2x128xf32>
    %cst_83 = arith.constant 1.000000e+00 : f32
    %228 = vector.broadcast %cst_83 : f32 to vector<2x128xf32>
    %229 = arith.addf %228, %227 : vector<2x128xf32>
    %230 = arith.divf %228, %229 : vector<2x128xf32>
    %231 = arith.mulf %222, %204 : vector<2x128xf32>
    %232 = arith.mulf %216, %224 : vector<2x128xf32>
    %233 = arith.addf %231, %232 : vector<2x128xf32>
    %234 = math.tanh %233 : vector<2x128xf32>
    %235 = arith.mulf %230, %234 : vector<2x128xf32>
    %236 = vector.extract_strided_slice %174 {offsets = [4, 0], sizes = [2, 512], strides = [1, 1]} : vector<8x512xf32> to vector<2x512xf32>
    %237 = arith.truncf %235 : vector<2x128xf32> to vector<2x128xbf16>
    %cst_84 = arith.constant dense<0.000000e+00> : vector<2x512xf32>
    %238 = tpu.matmul %237, %175, %cst_84 {dimension_numbers = #tpu.dot_dimension_numbers<[1], [0], [0], [1], [0, 0, 1, 1], [], []>} : vector<2x128xbf16>, vector<128x512xbf16>, vector<2x512xf32> -> vector<2x512xf32>
    %239 = arith.addf %236, %238 : vector<2x512xf32>
    %240 = vector.extract_strided_slice %239 {offsets = [0, 0], sizes = [2, 128], strides = [1, 1]} : vector<2x512xf32> to vector<2x128xf32>
    %241 = arith.negf %240 : vector<2x128xf32>
    %242 = math.exp %241 : vector<2x128xf32>
    %cst_85 = arith.constant 1.000000e+00 : f32
    %243 = vector.broadcast %cst_85 : f32 to vector<2x128xf32>
    %244 = arith.addf %243, %242 : vector<2x128xf32>
    %245 = arith.divf %243, %244 : vector<2x128xf32>
    %246 = vector.extract_strided_slice %239 {offsets = [0, 128], sizes = [2, 128], strides = [1, 1]} : vector<2x512xf32> to vector<2x128xf32>
    %247 = arith.negf %246 : vector<2x128xf32>
    %248 = math.exp %247 : vector<2x128xf32>
    %cst_86 = arith.constant 1.000000e+00 : f32
    %249 = vector.broadcast %cst_86 : f32 to vector<2x128xf32>
    %250 = arith.addf %249, %248 : vector<2x128xf32>
    %251 = arith.divf %249, %250 : vector<2x128xf32>
    %252 = vector.extract_strided_slice %239 {offsets = [0, 256], sizes = [2, 128], strides = [1, 1]} : vector<2x512xf32> to vector<2x128xf32>
    %253 = math.tanh %252 : vector<2x128xf32>
    %254 = vector.extract_strided_slice %239 {offsets = [0, 384], sizes = [2, 128], strides = [1, 1]} : vector<2x512xf32> to vector<2x128xf32>
    %255 = arith.negf %254 : vector<2x128xf32>
    %256 = math.exp %255 : vector<2x128xf32>
    %cst_87 = arith.constant 1.000000e+00 : f32
    %257 = vector.broadcast %cst_87 : f32 to vector<2x128xf32>
    %258 = arith.addf %257, %256 : vector<2x128xf32>
    %259 = arith.divf %257, %258 : vector<2x128xf32>
    %260 = arith.mulf %251, %233 : vector<2x128xf32>
    %261 = arith.mulf %245, %253 : vector<2x128xf32>
    %262 = arith.addf %260, %261 : vector<2x128xf32>
    %263 = math.tanh %262 : vector<2x128xf32>
    %264 = arith.mulf %259, %263 : vector<2x128xf32>
    %265 = vector.extract_strided_slice %174 {offsets = [6, 0], sizes = [2, 512], strides = [1, 1]} : vector<8x512xf32> to vector<2x512xf32>
    %266 = arith.truncf %264 : vector<2x128xf32> to vector<2x128xbf16>
    %cst_88 = arith.constant dense<0.000000e+00> : vector<2x512xf32>
    %267 = tpu.matmul %266, %175, %cst_88 {dimension_numbers = #tpu.dot_dimension_numbers<[1], [0], [0], [1], [0, 0, 1, 1], [], []>} : vector<2x128xbf16>, vector<128x512xbf16>, vector<2x512xf32> -> vector<2x512xf32>
    %268 = arith.addf %265, %267 : vector<2x512xf32>
    %269 = vector.extract_strided_slice %268 {offsets = [0, 0], sizes = [2, 128], strides = [1, 1]} : vector<2x512xf32> to vector<2x128xf32>
    %270 = arith.negf %269 : vector<2x128xf32>
    %271 = math.exp %270 : vector<2x128xf32>
    %cst_89 = arith.constant 1.000000e+00 : f32
    %272 = vector.broadcast %cst_89 : f32 to vector<2x128xf32>
    %273 = arith.addf %272, %271 : vector<2x128xf32>
    %274 = arith.divf %272, %273 : vector<2x128xf32>
    %275 = vector.extract_strided_slice %268 {offsets = [0, 128], sizes = [2, 128], strides = [1, 1]} : vector<2x512xf32> to vector<2x128xf32>
    %276 = arith.negf %275 : vector<2x128xf32>
    %277 = math.exp %276 : vector<2x128xf32>
    %cst_90 = arith.constant 1.000000e+00 : f32
    %278 = vector.broadcast %cst_90 : f32 to vector<2x128xf32>
    %279 = arith.addf %278, %277 : vector<2x128xf32>
    %280 = arith.divf %278, %279 : vector<2x128xf32>
    %281 = vector.extract_strided_slice %268 {offsets = [0, 256], sizes = [2, 128], strides = [1, 1]} : vector<2x512xf32> to vector<2x128xf32>
    %282 = math.tanh %281 : vector<2x128xf32>
    %283 = vector.extract_strided_slice %268 {offsets = [0, 384], sizes = [2, 128], strides = [1, 1]} : vector<2x512xf32> to vector<2x128xf32>
    %284 = arith.negf %283 : vector<2x128xf32>
    %285 = math.exp %284 : vector<2x128xf32>
    %cst_91 = arith.constant 1.000000e+00 : f32
    %286 = vector.broadcast %cst_91 : f32 to vector<2x128xf32>
    %287 = arith.addf %286, %285 : vector<2x128xf32>
    %288 = arith.divf %286, %287 : vector<2x128xf32>
    %289 = arith.mulf %280, %262 : vector<2x128xf32>
    %290 = arith.mulf %274, %282 : vector<2x128xf32>
    %291 = arith.addf %289, %290 : vector<2x128xf32>
    %292 = math.tanh %291 : vector<2x128xf32>
    %293 = arith.mulf %288, %292 : vector<2x128xf32>
    %294 = arith.truncf %293 : vector<2x128xf32> to vector<2x128xbf16>
    %c0_92 = arith.constant 0 : index
    %c2176 = arith.constant 2176 : index
    %295 = vector.load %arg3[%c0_92, %c2176] : memref<128x2688xbf16, #tpu.memory_space<vmem>>, vector<128x512xbf16>
    %cst_93 = arith.constant dense<0.000000e+00> : vector<2x512xf32>
    %296 = tpu.matmul %294, %295, %cst_93 {dimension_numbers = #tpu.dot_dimension_numbers<[1], [0], [0], [1], [0, 0, 1, 1], [], []>} : vector<2x128xbf16>, vector<128x512xbf16>, vector<2x512xf32> -> vector<2x512xf32>
    %c0_94 = arith.constant 0 : index
    %c1920 = arith.constant 1920 : index
    %297 = vector.load %arg4[%c0_94, %c1920] : memref<1x3072xf32, #tpu.memory_space<vmem>>, vector<1x512xf32>
    %298 = vector.broadcast %297 : vector<1x512xf32> to vector<2x512xf32>
    %299 = arith.addf %296, %298 : vector<2x512xf32>
    %cst_95 = arith.constant 0.000000e+00 : f32
    %300 = vector.broadcast %cst_95 : f32 to vector<2x512xf32>
    %301 = arith.maximumf %299, %300 : vector<2x512xf32>
    %c0_96 = arith.constant 0 : index
    %c2432 = arith.constant 2432 : index
    %302 = vector.load %arg4[%c0_96, %c2432] : memref<1x3072xf32, #tpu.memory_space<vmem>>, vector<1x512xf32>
    %303 = vector.broadcast %302 : vector<1x512xf32> to vector<2x512xf32>
    %304 = arith.mulf %301, %303 : vector<2x512xf32>
    %cst_97 = arith.constant dense<0.000000e+00> : vector<2xf32>
    %305 = vector.multi_reduction <add>, %304, %cst_97 [1] : vector<2x512xf32> to vector<2xf32>
    %306 = vector.shape_cast %305 : vector<2xf32> to vector<2x1xf32>
    %c0_98 = arith.constant 0 : index
    %c2944 = arith.constant 2944 : index
    %307 = vector.load %arg4[%c0_98, %c2944] : memref<1x3072xf32, #tpu.memory_space<vmem>>, vector<1x128xf32>
    %308 = vector.extract_strided_slice %307 {offsets = [0, 0], sizes = [1, 1], strides = [1, 1]} : vector<1x128xf32> to vector<1x1xf32>
    %309 = vector.broadcast %308 : vector<1x1xf32> to vector<2x1xf32>
    %310 = arith.addf %306, %309 : vector<2x1xf32>
    %c0_99 = arith.constant 0 : index
    %c0_100 = arith.constant 0 : index
    %311 = vector.load %arg5[%c0_99, %c0_100] : memref<2x1xf32, #tpu.memory_space<vmem>>, vector<2x1xf32>
    tpu.vector_store %arg5[%c0_99, %c0_100], %310 {strides = array<i32>} : memref<2x1xf32, #tpu.memory_space<vmem>>, vector<2x1xf32>,
    return
  }
}

</mosaic_0001>

<bundles_post_ra>
// kernel: snet_forward.1
= control target key start
LH: loop header
LB: loop body
LE: loop exit
PB: predicated region body
PF: predicated region fallthrough
CT: control target
= control target key end

     0   :  { %10 = vsyncpa [#allocation3], 0  ;;  %s3692_s18 = smov [#allocation2]   ;;  %s4172_s0 = inlined_call_operand.vmem [shape: f32[2,16,128], index: 0, kind: input, shape index: {}]   ;;  %s4173_s1 = inlined_call_operand.vmem [shape: f32[2,16,128], index: 1, kind: input, shape index: {}]   ;;  %s4174_s2 = inlined_call_operand.vmem [shape: f32[2,1,16], index: 2, kind: input, shape index: {}]   ;;  %s4175_s3 = inlined_call_operand.hbm [shape: bf16[128,2688], index: 3, kind: input, shape index: {}]   ;;  %s4176_s4 = inlined_call_operand.vmem [shape: f32[1,3072], index: 4, kind: input, shape index: {}]   ;;  %s4177_s5 = inlined_call_operand.vmem [shape: f32[2,1], index: 5, kind: output, shape index: {}]  }
   0x1   :  { %s22_s19 = sshll.u32 %s3692_s18, 4  ;;  %s3668_s22 = scalar_lea.hbm %s4175_s3, 21504  ;;  %s23_s19 = int_to_ptr.vmem [resolvable:$true] %s22_s19 }
   0x2   :  { %p3669_p0 = scmp.ne.s32.totalorder %s4175_s3, %s3668_s22  ;;  %p3672_p1 = scmp.lt.u32.totalorder %s3668_s22, %s4175_s3 }
   0x4   :  { %p3674_p2 = pnand %p3672_p1, %p3669_p0 }
   0x6   :  { %3677 = shalt.err (!%p3674_p2)
}
   0x7   :  { %s3678_s27 = scalar_lea.vmem %s23_s19, 21504  ;;  %p3683_p4 = scmp.lt.s32.totalorder %s23_s19, %s23_s19 }
   0x8   :  { %p3679_p3 = scmp.ne.s32.totalorder %s23_s19, %s3678_s27  ;;  %p3684_p5 = scmp.lt.s32.totalorder %s3678_s27, %s3678_s27 }
   0xa   :  { %p3685_p6 = por %p3684_p5, %p3683_p4 }
   0xc   :  { %p3686_p7 = pnand %p3685_p6, %p3679_p3 }
   0xe   :  { %3689 = shalt.err (!%p3686_p7)
}
   0xf   :  { %s3693_s28 = smov 1344   ;;  %s3694_s29 = smov 84  }
  0x10   :  { %28 = dma.hbm_to_vmem [thread:$0]  %s4175_s3, 21504, %s23_s19, [#allocation3], %s3693_s28, %s3693_s28, %s3694_s29  }
  0x11   :  { %3690 = dma.done.wait [#allocation3], 21504  }
  0x12   :  { %3691 = vsyncadd [#allocation3], 4294945792  ;;  %v35_v0 = vld [vmem:[%s4172_s0] sm:$0xff]  ;;  %v37_v1 = vld [vmem:[%s4172_s0 + $0x10] sm:$0xff]  ;;  %v3695_v41 = vmov 0   ;;  %v3696_v51 = vmov 0.0  }
  0x13   :  { %v36_v2 = vld [vmem:[%s4172_s0 + $0x8] sm:$0xff]  ;;  %47 = vadd.xlane.f32.xlu0 %v35_v0  ;;  %51 = vadd.xlane.f32.xlu1 %v37_v1  ;;  %v38_v3 = vld [vmem:[%s4172_s0 + $0x18] sm:$0xff]  ;;  %v3343_v6 = vld [vmem:[#allocation2 + $0xb0] ss:$84 sps:$4 sm:$0xff]   ;;  %vm3697_vm0 = vmmov 0   ;;  %vm505_vm4 = vcmask 130048  }
  0x14   :  { %v3340_v4 = vld [vmem:[#allocation2 + $0x8] ss:$84 sps:$4 sm:$0xff]   ;;  %v3342_v5 = vld [vmem:[#allocation2 + $0x4] ss:$84 sps:$4 sm:$0xff]   ;;  %v3345_v7 = vld [vmem:[#allocation2 + $0xac] ss:$84 sps:$4 sm:$0xff]   ;;  %376 = vmatprep.mubr.bf16.mxu1 %v3695_v41 }
  0x15   :  { %344 = vmatprep.subr.bf16.mxu1 %v3340_v4  ;;  %v3346_v8 = vld [vmem:[#allocation2 + $0x158] ss:$84 sps:$4 sm:$0xff]   ;;  %v3349_v9 = vld [vmem:[#allocation2] ss:$84 sps:$4 sm:$0xff]   ;;  %v3352_v28 = vld [vmem:[#allocation2 + $0x1fc] ss:$84 sps:$4 sm:$0xff]  }
  0x16   :  { %345 = vmatpush1.bf16.msra.mxu1 %v3342_v5  ;;  %3170 = vmatprep.subr.bf16.mxu0 %v3349_v9  ;;  %v3348_v10 = vld [vmem:[#allocation2 + $0x154] ss:$84 sps:$4 sm:$0xff]   ;;  %v3356_v31 = vld [vmem:[#allocation2 + $0x2a4] ss:$84 sps:$4 sm:$0xff]   ;;  %v3360_v34 = vld [vmem:[#allocation2 + $0x34c] ss:$84 sps:$4 sm:$0xff]  }
  0x17   :  { %49 = vadd.xlane.f32.xlu0 %v36_v2  ;;  %53 = vadd.xlane.f32.xlu1 %v38_v3  ;;  %v3350_v27 = vld [vmem:[#allocation2 + $0x200] ss:$84 sps:$4 sm:$0xff]   ;;  %v3353_v29 = vld [vmem:[#allocation2 + $0xa8] ss:$84 sps:$4 sm:$0xff]   ;;  %v3357_v32 = vld [vmem:[#allocation2 + $0x150] ss:$84 sps:$4 sm:$0xff]  }
  0x18   :  { %346 = vmatprep.subr.bf16.mxu1 %v3343_v6  ;;  %3171 = vmatpush3.bf16.msra.mxu0 %v3349_v9  ;;  %v3354_v30 = vld [vmem:[#allocation2 + $0x2a8] ss:$84 sps:$4 sm:$0xff]   ;;  %v3358_v33 = vld [vmem:[#allocation2 + $0x350] ss:$84 sps:$4 sm:$0xff]   ;;  %v3361_v35 = vld [vmem:[#allocation2 + $0x1f8] ss:$84 sps:$4 sm:$0xff]  }
  0x19   :  { %3172 = vmatprep.subr.bf16.mxu0 %v3353_v29  ;;  %v3362_v36 = vld [vmem:[#allocation2 + $0x3f8] ss:$84 sps:$4 sm:$0xff]   ;;  %v3364_v37 = vld [vmem:[#allocation2 + $0x3f4] ss:$84 sps:$4 sm:$0xff]   ;;  %v3368_v42 = vld [vmem:[#allocation2 + $0x49c] ss:$84 sps:$4 sm:$0xff]  }
  0x1a   :  { %347 = vmatpush1.bf16.msra.mxu1 %v3345_v7  ;;  %v3365_v38 = vld [vmem:[#allocation2 + $0x2a0] ss:$84 sps:$4 sm:$0xff]   ;;  %v3369_v40 = vld [vmem:[#allocation2 + $0x348] ss:$84 sps:$4 sm:$0xff]   ;;  %v3370_v45 = vld [vmem:[#allocation2 + $0x3f0] ss:$84 sps:$4 sm:$0xff]  }
  0x1b   :  { %348 = vmatprep.subr.bf16.mxu1 %v3346_v8  ;;  %v3366_v39 = vld [vmem:[#allocation2 + $0x4a0] ss:$84 sps:$4 sm:$0xff]   ;;  %v40_v44 = vld [vmem:[%s4173_s1 + $0x8] sm:$0xff]  ;;  %v42_v49 = vld [vmem:[%s4173_s1 + $0x18] sm:$0xff]  ;;  %vm1442_vm6 = vcmask 1046528   ;;  %vm1452_vm7 = vcmask 1045504  }
  0x1c   :  { %3173 = vmatpush3.bf16.msra.mxu0 %v3353_v29  ;;  %v39_v43 = vld [vmem:[%s4173_s1] sm:$0xff]  ;;  %v3371_v47 = vld [vmem:[#allocation2 + $0x498] ss:$84 sps:$4 sm:$0xff]   ;;  %v41_v48 = vld [vmem:[%s4173_s1 + $0x10] sm:$0xff]  ;;  %vm1488_vm8 = vcmask 1042432   ;;  %vm1520_vm9 = vcmask 1040384  }
  0x1d   :  { %3174 = vmatprep.subr.bf16.mxu0 %v3357_v32  ;;  %v234_v46 = vpack.c.bf16 %v40_v44, %v39_v43  ;;  %v235_v50 = vpack.c.bf16 %v42_v49, %v41_v48  ;;  %v2901_v7 = vld [vmem:[%s4176_s4 + $0x1] ss:$0 sm:$0xff]  ;;  %v2902_v49 = vld [vmem:[%s4176_s4 + $0x4] ss:$0 sm:$0xff]  ;;  %vm1538_vm10 = vcmask 1043457   ;;  %vm1503_vm11 = vcmask 1045507  }
  0x1e   :  { %349 = vmatpush1.bf16.msra.mxu1 %v3348_v10  ;;  %vm1518_vm12 = vcmask 1047558   ;;  %vm1554_vm13 = vcmask 1041408   ;;  %vm1557_vm14 = vcmask 1043456   ;;  %vm1559_vm15 = vcmask 1044480  }
  0x1f   :  { %350 = vmatprep.subr.bf16.mxu1 %v3350_v27 }
  0x20   :  { %3175 = vmatpush3.bf16.msra.mxu0 %v3357_v32 }
  0x21   :  { %3176 = vmatprep.subr.bf16.mxu0 %v3361_v35 }
  0x22   :  { %351 = vmatpush1.bf16.msra.mxu1 %v3352_v28 }
  0x23   :  { %352 = vmatprep.subr.bf16.mxu1 %v3354_v30 }
  0x24   :  { %3177 = vmatpush3.bf16.msra.mxu0 %v3361_v35 }
  0x25   :  { %3178 = vmatprep.subr.bf16.mxu0 %v3365_v38 }
  0x26   :  { %353 = vmatpush1.bf16.msra.mxu1 %v3356_v31 }
  0x27   :  { %354 = vmatprep.subr.bf16.mxu1 %v3358_v33 }
  0x28   :  { %3179 = vmatpush3.bf16.msra.mxu0 %v3365_v38 }
  0x29   :  { %3180 = vmatprep.subr.bf16.mxu0 %v3369_v40 }
  0x2a   :  { %355 = vmatpush1.bf16.msra.mxu1 %v3360_v34 }
  0x2b   :  { %356 = vmatprep.subr.bf16.mxu1 %v3362_v36 }
  0x2c   :  { %3181 = vmatpush3.bf16.msra.mxu0 %v3369_v40 }
  0x2d   :  { %3182 = vmatprep.subr.bf16.mxu0 %v3370_v45 }
  0x2e   :  { %357 = vmatpush1.bf16.msra.mxu1 %v3364_v37 }
  0x2f   :  { %358 = vmatprep.subr.bf16.mxu1 %v3366_v39 }
  0x30   :  { %3183 = vmatpush3.bf16.msra.mxu0 %v3370_v45 }
  0x31   :  { %3184 = vmatprep.subr.bf16.mxu0 %v3371_v47 }
  0x32   :  { %359 = vmatpush1.bf16.msra.mxu1 %v3368_v42 }
  0x33   :  { %3202 = vmatprep.subr.bf16.mxu1 %v3696_v51 }
  0x34   :  { %3185 = vmatpush3.bf16.msra.mxu0 %v3371_v47 }
  0x35   :  { %377 = vmatmul.mubr.bf16.vlgmr.msra.gmra.mrb[0].mxu1 %v234_v46  ;;  %3190 = vmatprep.subr.bf16.mxu0 %v3696_v51 }
  0x36   :  { %386 = vmatprep.mubr.bf16.mxu1 %v3695_v41 }
  0x3d   :  { %387 = vmatmul.mubr.bf16.gmra.mrb[4].mxu1 %v235_v50 }
  0x3e   :  { %3204 = vmatprep.mubr.msk.bf16.mxu1 %vm3697_vm0, %v3696_v51 }
  0xa0   :  { %v48_v11 = vpop.xlane.xlu0 %47  ;;  %v52_v12 = vpop.xlane.xlu1 %51 }
  0xa1   :  { %v56_v13 = vmul.f32 0.0078125, %v48_v11  ;;  %v58_v14 = vmul.f32 0.0078125, %v52_v12 }
  0xa3   :  { %v3752_v15 = vsub.f32 %v35_v0, %v56_v13  ;;  %v3754_v16 = vsub.f32 %v37_v1, %v58_v14 }
  0xa4   :  { %v50_v17 = vpop.xlane.xlu0 %49  ;;  %v54_v18 = vpop.xlane.xlu1 %53 }
  0xa5   :  { %v57_v19 = vmul.f32 0.0078125, %v50_v17  ;;  %v64_v20 = vmul.f32 %v3752_v15, %v3752_v15  ;;  %v59_v21 = vmul.f32 0.0078125, %v54_v18  ;;  %v66_v24 = vmul.f32 %v3754_v16, %v3754_v16 }
  0xa7   :  { %v3758_v22 = vsub.f32 %v36_v2, %v57_v19  ;;  %68 = vadd.xlane.f32.xlu0 %v64_v20  ;;  %v3760_v23 = vsub.f32 %v38_v3, %v59_v21  ;;  %v2900_v2 = vld [vmem:[%s4176_s4] ss:$0 sm:$0xff]  ;;  %v254_v21 = vlaneseq }
  0xa9   :  { %v65_v25 = vmul.f32 %v3758_v22, %v3758_v22  ;;  %v67_v26 = vmul.f32 %v3760_v23, %v3760_v23 }
  0xab   :  { %72 = vadd.xlane.f32.xlu0 %v66_v24  ;;  %70 = vadd.xlane.f32.xlu1 %v65_v25 }
  0xaf   :  { %74 = vadd.xlane.f32.xlu1 %v67_v26 }
 0x108   :  { %v378_v27 = vpop.f32.mrb[0].mxu1 }
 0x109   :  { %v380_v29 = vpop.f32.mrb[1].mxu1 }
 0x10a   :  { %v382_v31 = vpop.f32.mrb[2].mxu1 }
 0x10b   :  { %v384_v33 = vpop.f32.mrb[3].mxu1 }
 0x110   :  { %v388_v37 = vpop.f32.mrb[4].mxu1 }
 0x111   :  { %v390_v39 = vpop.f32.mrb[5].mxu1 }
 0x112   :  { %v392_v42 = vpop.f32.mrb[6].mxu1 }
 0x113   :  { %v394_v44 = vpop.f32.mrb[7].mxu1 }
 0x134   :  { %v69_v52 = vpop.xlane.xlu0 %68 }
 0x135   :  { %v76_v53 = vmul.f32 0.0078125, %v69_v52 }
 0x137   :  { %v80_v54 = vadd.f32 1e-05, %v76_v53 }
 0x138   :  { %v71_v55 = vpop.xlane.xlu1 %70  ;;  %v73_v56 = vpop.xlane.xlu0 %72 }
 0x139   :  { %3564 = vrsqrt.f32 %v80_v54  ;;  %v77_v57 = vmul.f32 0.0078125, %v71_v55  ;;  %v78_v58 = vmul.f32 0.0078125, %v73_v56 }
 0x13b   :  { %v81_v59 = vadd.f32 1e-05, %v77_v57  ;;  %v82_v60 = vadd.f32 1e-05, %v78_v58 }
 0x13c   :  { %v75_v61 = vpop.xlane.xlu1 %74 }
 0x13d   :  { %3566 = vrsqrt.f32 %v81_v59  ;;  %v79_v62 = vmul.f32 0.0078125, %v75_v61 }
 0x13e   :  { %3568 = vrsqrt.f32 %v82_v60  ;;  %v43_v60 = vld [vmem:[%s4174_s2] sm:$0x1] }
 0x13f   :  { %v83_v63 = vadd.f32 1e-05, %v79_v62  ;;  %vm487_vm1 = vcmp.gt.f32.partialorder %v43_v60, 0.5  ;;  %v44_v62 = vld [vmem:[%s4174_s2 + $0x1] sm:$0x1] }
 0x140   :  { %v489_v61 = vsel %vm487_vm1, 1, %v3695_v41  ;;  %vm488_vm2 = vcmp.gt.f32.partialorder %v44_v62, 0.5 }
 0x141   :  { %3570 = vrsqrt.f32 %v83_v63 }
 0x143   :  { %v3565_v0 = vpop.eup %3564 }
 0x144   :  { %v88_v1 = vmul.f32 %v3565_v0, %v3752_v15 }
 0x146   :  { %v98_v6 = vmul.f32 %v2900_v2, %v88_v1 }
 0x147   :  { %v3567_v3 = vpop.eup %3566 }
 0x148   :  { %v3569_v4 = vpop.eup %3568  ;;  %v89_v5 = vmul.f32 %v3567_v3, %v3758_v22  ;;  %v108_v11 = vadd.f32 %v2901_v7, %v98_v6  ;;  %v3794_v22 = vshrl.u32 %v254_v21, 7 }
 0x149   :  { %v90_v8 = vmul.f32 %v3569_v4, %v3754_v16  ;;  %v252_v16 = vld [vmem:[%s4176_s4 + $0x5] sm:$0x3] }
 0x14a   :  { %v99_v9 = vmul.f32 %v2900_v2, %v89_v5  ;;  %v3797_v24 = vsub.s32 0, %v3794_v22 }
 0x14b   :  { %v3571_v10 = vpop.eup %3570  ;;  %v100_v14 = vmul.f32 %v2900_v2, %v90_v8 }
 0x14c   :  { %v109_v12 = vadd.f32 %v2901_v7, %v99_v9  ;;  %v91_v13 = vmul.f32 %v3571_v10, %v3760_v23  ;;  %v3803_v23 = vsub.s32 1, %v3794_v22  ;;  %v257_v25 = vrot.slane %v252_v16, %v3797_v24 }
 0x14d   :  { %v110_v18 = vadd.f32 %v2901_v7, %v100_v14  ;;  %v494_v63 = vrot.slane %v489_v61, %v3797_v24 }
 0x14e   :  { %v112_v15 = vpack.c.bf16 %v109_v12, %v108_v11  ;;  %v101_v17 = vmul.f32 %v2900_v2, %v91_v13  ;;  %v261_v26 = vrot.slane %v252_v16, %v3803_v23  ;;  %v379_v28 = vadd.f32 %v378_v27, %v257_v25 }
 0x14f   :  { %v383_v32 = vadd.f32 %v382_v31, %v257_v25  ;;  %v389_v38 = vadd.f32 %v388_v37, %v257_v25  ;;  %v393_v43 = vadd.f32 %v392_v42, %v257_v25  ;;  %vm499_vm3 = vcmp.eq.s32.totalorder %v494_v63, 1  ;;  %v3375_v63 = vld [vmem:[#allocation2 + $0x204] ss:$84 sps:$4 sm:$0xff]  }
 0x150   :  { %3186 = vmatprep.mubr.bf16.mxu0 %v112_v15  ;;  %v111_v19 = vadd.f32 %v2901_v7, %v101_v17  ;;  %v381_v30 = vadd.f32 %v380_v29, %v261_v26  ;;  %v385_v34 = vadd.f32 %v384_v33, %v261_v26  ;;  %v391_v40 = vadd.f32 %v390_v39, %v261_v26 }
 0x151   :  { %v399_v35 = vpack.c.bf16 %v383_v32, %v379_v28  ;;  %v395_v45 = vadd.f32 %v394_v44, %v261_v26  ;;  %v400_v46 = vpack.c.bf16 %v393_v43, %v389_v38 }
 0x152   :  { %v113_v20 = vpack.c.bf16 %v111_v19, %v110_v18  ;;  %v552_v36 = vpack.c.bf16 %v385_v34, %v381_v30 }
 0x153   :  { %v553_v47 = vpack.c.bf16 %v395_v45, %v391_v40  ;;  %v3372_v45 = vld [vmem:[#allocation2 + $0xc] ss:$84 sps:$4 sm:$0xff]  }
 0x154   :  { %3187 = vmatmul.mubr.bf16.vlgmr.msra.gmra.mrb[0].mxu0 %v113_v20  ;;  %3203 = vmatpush3.bf16.msra.mxu1 %v552_v36 }
 0x155   :  { %3191 = vmatpush3.bf16.xpose.msra.mxu0 %v399_v35  ;;  %3192 = vmatprep.mubr.msk.bf16.mxu0 %vm3697_vm0, %v3696_v51 }
 0x156   :  { %3196 = vmatprep.subr.bf16.mxu0 %v3696_v51  ;;  %3214 = vmatprep.subr.bf16.mxu1 %v3372_v45 }
 0x227   :  { %v3188_v48 = vpop.f32.mrb[0].mxu0 }
 0x228   :  { %v219_v50 = vpop.f32.mrb[1].mxu0  ;;  %v228_v53 = vadd.f32 %v3188_v48, %v2902_v49 }
 0x229   :  { %v3189_v52 = vpop.f32.mrb[2].mxu0  ;;  %v220_v56 = vadd.f32 %v2902_v49, %v219_v50 }
 0x22a   :  { %v231_v54 = vadd.f32 %v3189_v52, %v2902_v49  ;;  %v222_v55 = vpop.f32.mrb[3].mxu0 }
 0x22b   :  { %v223_v57 = vadd.f32 %v2902_v49, %v222_v55 }
 0x22c   :  { %v398_v58 = vpack.c.bf16 %v231_v54, %v228_v53 }
 0x22d   :  { %v397_v59 = vpack.c.bf16 %v223_v57, %v220_v56  ;;  %v3373_v56 = vld [vmem:[#allocation2 + $0xb4] ss:$84 sps:$4 sm:$0xff]  }
 0x22f   :  { %3193 = vmatmul.mubr.bf16.vlgmr.msra.gmra.mrb[4].mxu0 %v397_v59 }
 0x230   :  { %3197 = vmatpush3.bf16.xpose.msra.mxu0 %v400_v46  ;;  %3198 = vmatprep.mubr.msk.bf16.mxu0 %vm3697_vm0, %v3696_v51 }
 0x231   :  { %3208 = vmatprep.subr.bf16.mxu0 %v3696_v51 }
 0x237   :  { %3199 = vmatmul.mubr.bf16.vlgmr.msra.gmra.mrb[8].mxu0 %v398_v58  ;;  %v3374_v58 = vld [vmem:[#allocation2 + $0x15c] ss:$84 sps:$4 sm:$0xff]  }
 0x238   :  { %3209 = vmatpush3.bf16.msra.mxu0 %v553_v47  ;;  %3210 = vmatprep.mubr.msk.bf16.mxu0 %vm3697_vm0, %v3696_v51  ;;  %v490_v51 = vsel %vm488_vm2, 1, %v3695_v41  ;;  %vm2893_vm0 = vcmask 1024  }
 0x239   :  { %v498_v8 = vrot.slane %v490_v51, %v3797_v24  ;;  %v3379_v51 = vld [vmem:[#allocation2 + $0x4a4] ss:$84 sps:$4 sm:$0xff]  }
 0x23b   :  { %vm500_vm5 = vcmp.eq.s32.totalorder %v498_v8, 1 }
 0x302   :  { %v435_v0 = vpop.f32.mrb[4].mxu0 }
 0x303   :  { %v483_v1 = vmul.f32 0.088388346, %v435_v0  ;;  %v3194_v2 = vpop.f32.mrb[5].mxu0  ;;  %v3376_v0 = vld [vmem:[#allocation2 + $0x2ac] ss:$84 sps:$4 sm:$0xff]  }
 0x304   :  { %v438_v3 = vpop.f32.mrb[6].mxu0  ;;  %v3378_v2 = vld [vmem:[#allocation2 + $0x3fc] ss:$84 sps:$4 sm:$0xff]  }
 0x305   :  { %v484_v4 = vmul.f32 0.088388346, %v438_v3  ;;  %v3195_v5 = vpop.f32.mrb[7].mxu0  ;;  %v501_v6 = vsel %vm499_vm3, -10000.0, %v483_v1  ;;  %v3377_v1 = vld [vmem:[#allocation2 + $0x354] ss:$84 sps:$4 sm:$0xff]  }
 0x306   :  { %v506_v7 = vsel %vm505_vm4, %v501_v6, -inf }
 0x307   :  { %507 = vmax.xlane.f32.xlu0 %v506_v7  ;;  %v502_v9 = vsel %vm499_vm3, -10000.0, %v484_v4 }
 0x308   :  { %v509_v10 = vsel %vm505_vm4, %v502_v9, -inf }
 0x309   :  { %510 = vmax.xlane.f32.xlu1 %v509_v10 }
 0x30a   :  { %v476_v11 = vpop.f32.mrb[8].mxu0 }
 0x30b   :  { %v485_v12 = vmul.f32 0.088388346, %v476_v11  ;;  %v3200_v13 = vpop.f32.mrb[9].mxu0 }
 0x30c   :  { %v479_v14 = vpop.f32.mrb[10].mxu0  ;;  %v2929_v13 = vld [vmem:[%s4176_s4 + $0x7] ss:$0 sm:$0xff] }
 0x30d   :  { %v486_v15 = vmul.f32 0.088388346, %v479_v14  ;;  %v3201_v17 = vpop.f32.mrb[11].mxu0  ;;  %v503_v18 = vsel %vm500_vm5, -10000.0, %v485_v12 }
 0x30e   :  { %v512_v19 = vsel %vm505_vm4, %v503_v18, -inf }
 0x30f   :  { %513 = vmax.xlane.f32.xlu0 %v512_v19  ;;  %v504_v20 = vsel %vm500_vm5, -10000.0, %v486_v15 }
 0x310   :  { %v515_v21 = vsel %vm505_vm4, %v504_v20, -inf }
 0x311   :  { %516 = vmax.xlane.f32.xlu1 %v515_v21 }
 0x394   :  { %v508_v16 = vpop.xlane.xlu0 %507 }
 0x395   :  { %v518_v25 = vsub.f32 %v501_v6, %v508_v16 }
 0x396   :  { %v511_v26 = vpop.xlane.xlu1 %510 }
 0x397   :  { %v522_v27 = vmul.f32 1.442695, %v518_v25  ;;  %v519_v28 = vsub.f32 %v502_v9, %v511_v26  ;;  %v3380_v25 = vld [vmem:[#allocation2 + $0x10] ss:$84 sps:$4 sm:$0xff]  }
 0x398   :  { %3234 = vmatprep.subr.bf16.mxu0 %v3380_v25 }
 0x399   :  { %3572 = vpow2.f32 %v522_v27  ;;  %v524_v29 = vmul.f32 1.442695, %v519_v28 }
 0x39b   :  { %3574 = vpow2.f32 %v524_v29 }
 0x39c   :  { %v514_v30 = vpop.xlane.xlu0 %513 }
 0x39d   :  { %v520_v31 = vsub.f32 %v503_v18, %v514_v30 }
 0x39e   :  { %v517_v32 = vpop.xlane.xlu1 %516 }
 0x39f   :  { %v526_v33 = vmul.f32 1.442695, %v520_v31  ;;  %v521_v34 = vsub.f32 %v504_v20, %v517_v32 }
 0x3a1   :  { %3576 = vpow2.f32 %v526_v33  ;;  %v528_v35 = vmul.f32 1.442695, %v521_v34 }
 0x3a3   :  { %v3573_v36 = vpop.eup %3572  ;;  %3578 = vpow2.f32 %v528_v35 }
 0x3a4   :  { %v530_v37 = vsel %vm505_vm4, %v3573_v36, 0.0 }
 0x3a5   :  { %v3575_v38 = vpop.eup %3574  ;;  %531 = vadd.xlane.f32.xlu0 %v530_v37 }
 0x3a6   :  { %v533_v39 = vsel %vm505_vm4, %v3575_v38, 0.0 }
 0x3a7   :  { %534 = vadd.xlane.f32.xlu1 %v533_v39 }
 0x3ab   :  { %v3577_v40 = vpop.eup %3576 }
 0x3ac   :  { %v536_v42 = vsel %vm505_vm4, %v3577_v40, 0.0 }
 0x3ad   :  { %v3579_v43 = vpop.eup %3578  ;;  %537 = vadd.xlane.f32.xlu0 %v536_v42 }
 0x3ae   :  { %v539_v44 = vsel %vm505_vm4, %v3579_v43, 0.0 }
 0x3af   :  { %540 = vadd.xlane.f32.xlu1 %v539_v44  ;;  %v3382_v44 = vld [vmem:[#allocation2 + $0x160] ss:$84 sps:$4 sm:$0xff]  }
 0x432   :  { %v532_v46 = vpop.xlane.xlu0 %531 }
 0x433   :  { %3580 = vrcp.f32 %v532_v46  ;;  %v3384_v46 = vld [vmem:[#allocation2 + $0x2b0] ss:$84 sps:$4 sm:$0xff]  }
 0x434   :  { %v535_v47 = vpop.xlane.xlu1 %534 }
 0x435   :  { %3582 = vrcp.f32 %v535_v47  ;;  %v3385_v47 = vld [vmem:[#allocation2 + $0x358] ss:$84 sps:$4 sm:$0xff]  }
 0x43a   :  { %v538_v48 = vpop.xlane.xlu0 %537 }
 0x43b   :  { %3584 = vrcp.f32 %v538_v48  ;;  %v3386_v48 = vld [vmem:[#allocation2 + $0x400] ss:$84 sps:$4 sm:$0xff]  }
 0x43c   :  { %v541_v49 = vpop.xlane.xlu1 %540 }
 0x43d   :  { %v3581_v50 = vpop.eup %3580  ;;  %3586 = vrcp.f32 %v541_v49  ;;  %v3387_v49 = vld [vmem:[#allocation2 + $0x4a8] ss:$84 sps:$4 sm:$0xff]  }
 0x43e   :  { %v546_v53 = vmul.f32 %v3581_v50, %v3573_v36  ;;  %v3388_v50 = vld [vmem:[#allocation2 + $0x14] ss:$84 sps:$4 sm:$0xff]  }
 0x43f   :  { %v3583_v52 = vpop.eup %3582 }
 0x440   :  { %v547_v54 = vmul.f32 %v3583_v52, %v3575_v38  ;;  %v3389_v52 = vld [vmem:[#allocation2 + $0xbc] ss:$84 sps:$4 sm:$0xff]  }
 0x442   :  { %v550_v55 = vpack.c.bf16 %v547_v54, %v546_v53 }
 0x444   :  { %3205 = vmatmul.mubr.msk.bf16.vlgmr.msra.gmra.mrb[8].mxu1 %vm505_vm4, %v550_v55 }
 0x445   :  { %v3585_v57 = vpop.eup %3584  ;;  %3215 = vmatpush3.bf16.msra.mxu1 %v3372_v45  ;;  %v3383_v45 = vld [vmem:[#allocation2 + $0x208] ss:$84 sps:$4 sm:$0xff]  }
 0x446   :  { %3216 = vmatprep.subr.bf16.mxu1 %v3373_v56  ;;  %v548_v60 = vmul.f32 %v3585_v57, %v3577_v40 }
 0x447   :  { %v3587_v59 = vpop.eup %3586 }
 0x448   :  { %v549_v61 = vmul.f32 %v3587_v59, %v3579_v43  ;;  %v3381_v43 = vld [vmem:[#allocation2 + $0xb8] ss:$84 sps:$4 sm:$0xff]  }
 0x449   :  { %3217 = vmatpush3.bf16.msra.mxu1 %v3373_v56 }
 0x44a   :  { %v551_v62 = vpack.c.bf16 %v549_v61, %v548_v60  ;;  %3218 = vmatprep.subr.bf16.mxu1 %v3374_v58 }
 0x44c   :  { %3211 = vmatmul.mubr.msk.bf16.vlgmr.msra.gmra.mrb[12].mxu0 %vm505_vm4, %v551_v62 }
 0x44d   :  { %3219 = vmatpush3.bf16.msra.mxu1 %v3374_v58  ;;  %3235 = vmatpush3.bf16.msra.mxu0 %v3380_v25  ;;  %v3392_v25 = vld [vmem:[#allocation2 + $0x2b4] ss:$84 sps:$4 sm:$0xff]  }
 0x44e   :  { %3220 = vmatprep.subr.bf16.mxu1 %v3375_v63  ;;  %3236 = vmatprep.subr.bf16.mxu0 %v3381_v43 }
 0x451   :  { %3221 = vmatpush3.bf16.msra.mxu1 %v3375_v63  ;;  %3237 = vmatpush3.bf16.msra.mxu0 %v3381_v43 }
 0x452   :  { %3222 = vmatprep.subr.bf16.mxu1 %v3376_v0  ;;  %3238 = vmatprep.subr.bf16.mxu0 %v3382_v44 }
 0x455   :  { %3223 = vmatpush3.bf16.msra.mxu1 %v3376_v0  ;;  %3239 = vmatpush3.bf16.msra.mxu0 %v3382_v44 }
 0x456   :  { %3224 = vmatprep.subr.bf16.mxu1 %v3377_v1  ;;  %3240 = vmatprep.subr.bf16.mxu0 %v3383_v45 }
 0x459   :  { %3225 = vmatpush3.bf16.msra.mxu1 %v3377_v1  ;;  %3241 = vmatpush3.bf16.msra.mxu0 %v3383_v45 }
 0x45a   :  { %3226 = vmatprep.subr.bf16.mxu1 %v3378_v2  ;;  %3242 = vmatprep.subr.bf16.mxu0 %v3384_v46 }
 0x45d   :  { %3227 = vmatpush3.bf16.msra.mxu1 %v3378_v2  ;;  %3243 = vmatpush3.bf16.msra.mxu0 %v3384_v46  ;;  %v2938_v2 = vld [vmem:[%s4176_s4 + $0x2] ss:$0 sm:$0xff] }
 0x45e   :  { %3228 = vmatprep.subr.bf16.mxu1 %v3379_v51  ;;  %3244 = vmatprep.subr.bf16.mxu0 %v3385_v47 }
 0x461   :  { %3229 = vmatpush3.bf16.msra.mxu1 %v3379_v51  ;;  %3245 = vmatpush3.bf16.msra.mxu0 %v3385_v47 }
 0x462   :  { %3246 = vmatprep.subr.bf16.mxu0 %v3386_v48  ;;  %3254 = vmatprep.subr.bf16.mxu1 %v3388_v50 }
 0x465   :  { %3247 = vmatpush3.bf16.msra.mxu0 %v3386_v48 }
 0x466   :  { %3248 = vmatprep.subr.bf16.mxu0 %v3387_v49 }
 0x469   :  { %3249 = vmatpush3.bf16.msra.mxu0 %v3387_v49 }
 0x517   :  { %v591_v3 = vpop.f32.mrb[8].mxu1 }
 0x518   :  { %v3206_v4 = vpop.f32.mrb[9].mxu1 }
 0x519   :  { %v594_v5 = vpop.f32.mrb[10].mxu1 }
 0x51a   :  { %v642_v6 = vpack.c.bf16 %v594_v5, %v591_v3  ;;  %v3207_v7 = vpop.f32.mrb[11].mxu1 }
 0x51b   :  { %v2939_v7 = vld [vmem:[%s4176_s4 + $0x3] ss:$0 sm:$0xff] }
 0x51c   :  { %3230 = vmatprep.mubr.bf16.mxu1 %v642_v6 }
 0x51f   :  { %v635_v8 = vpop.f32.mrb[12].mxu0 }
 0x520   :  { %v3212_v9 = vpop.f32.mrb[13].mxu0 }
 0x521   :  { %v638_v10 = vpop.f32.mrb[14].mxu0 }
 0x522   :  { %v643_v11 = vpack.c.bf16 %v638_v10, %v635_v8  ;;  %v3213_v12 = vpop.f32.mrb[15].mxu0 }
 0x524   :  { %3231 = vmatmul.mubr.bf16.vlgmr.msra.gmra.mrb[12].mxu1 %v643_v11 }
 0x525   :  { %3255 = vmatpush3.bf16.msra.mxu1 %v3388_v50 }
 0x526   :  { %3256 = vmatprep.subr.bf16.mxu1 %v3389_v52 }
 0x529   :  { %3257 = vmatpush3.bf16.msra.mxu1 %v3389_v52 }
 0x5f7   :  { %v3232_v14 = vpop.f32.mrb[12].mxu1 }
 0x5f8   :  { %v749_v15 = vpop.f32.mrb[13].mxu1  ;;  %v758_v21 = vadd.f32 %v3232_v14, %v2929_v13 }
 0x5f9   :  { %v750_v17 = vadd.f32 %v2929_v13, %v749_v15  ;;  %v3233_v18 = vpop.f32.mrb[14].mxu1 }
 0x5fa   :  { %v752_v19 = vpop.f32.mrb[15].mxu1  ;;  %v761_v16 = vadd.f32 %v3233_v18, %v2929_v13 }
 0x5fb   :  { %v753_v20 = vadd.f32 %v2929_v13, %v752_v19  ;;  %766 = vadd.xlane.f32.xlu0 %v750_v17 }
 0x5fd   :  { %768 = vadd.xlane.f32.xlu1 %v753_v20 }
 0x5ff   :  { %770 = vadd.xlane.f32.xlu0 %v758_v21 }
 0x601   :  { %772 = vadd.xlane.f32.xlu1 %v761_v16 }
 0x688   :  { %v767_v26 = vpop.xlane.xlu0 %766 }
 0x689   :  { %v774_v27 = vmul.f32 0.0078125, %v767_v26  ;;  %v3393_v26 = vld [vmem:[#allocation2 + $0x35c] ss:$84 sps:$4 sm:$0xff]  }
 0x68a   :  { %v769_v28 = vpop.xlane.xlu1 %768 }
 0x68b   :  { %v778_v29 = vsub.f32 %v750_v17, %v774_v27  ;;  %v775_v30 = vmul.f32 0.0078125, %v769_v28  ;;  %v3394_v27 = vld [vmem:[#allocation2 + $0x404] ss:$84 sps:$4 sm:$0xff]   ;;  %v3395_v28 = vld [vmem:[#allocation2 + $0x4ac] ss:$84 sps:$4 sm:$0xff]  }
 0x68c   :  { %v771_v31 = vpop.xlane.xlu0 %770 }
 0x68d   :  { %v779_v32 = vsub.f32 %v753_v20, %v775_v30  ;;  %v776_v33 = vmul.f32 0.0078125, %v771_v31  ;;  %v782_v34 = vmul.f32 %v778_v29, %v778_v29  ;;  %v3397_v30 = vld [vmem:[#allocation2 + $0x1c] ss:$84 sps:$4 sm:$0xff]   ;;  %v3398_v31 = vld [vmem:[#allocation2 + $0xc0] ss:$84 sps:$4 sm:$0xff]  }
 0x68e   :  { %v773_v35 = vpop.xlane.xlu1 %772 }
 0x68f   :  { %v780_v36 = vsub.f32 %v758_v21, %v776_v33  ;;  %v777_v37 = vmul.f32 0.0078125, %v773_v35  ;;  %786 = vadd.xlane.f32.xlu0 %v782_v34  ;;  %v783_v38 = vmul.f32 %v779_v32, %v779_v32  ;;  %v3390_v21 = vld [vmem:[#allocation2 + $0x164] ss:$84 sps:$4 sm:$0xff]   ;;  %v3406_v35 = vld [vmem:[#allocation2 + $0x360] ss:$84 sps:$4 sm:$0xff]  }
 0x690   :  { %3258 = vmatprep.subr.bf16.mxu1 %v3390_v21  ;;  %v3402_v33 = vld [vmem:[#allocation2 + $0x210] ss:$84 sps:$4 sm:$0xff]   ;;  %v3404_v34 = vld [vmem:[#allocation2 + $0x2b8] ss:$84 sps:$4 sm:$0xff]  }
 0x691   :  { %v781_v39 = vsub.f32 %v761_v16, %v777_v37  ;;  %788 = vadd.xlane.f32.xlu1 %v783_v38  ;;  %v784_v40 = vmul.f32 %v780_v36, %v780_v36  ;;  %3259 = vmatpush3.bf16.msra.mxu1 %v3390_v21  ;;  %v3391_v16 = vld [vmem:[#allocation2 + $0x20c] ss:$84 sps:$4 sm:$0xff]  }
 0x692   :  { %3260 = vmatprep.subr.bf16.mxu1 %v3391_v16 }
 0x693   :  { %790 = vadd.xlane.f32.xlu0 %v784_v40  ;;  %v785_v42 = vmul.f32 %v781_v39, %v781_v39 }
 0x695   :  { %792 = vadd.xlane.f32.xlu1 %v785_v42  ;;  %3261 = vmatpush3.bf16.msra.mxu1 %v3391_v16 }
 0x696   :  { %3262 = vmatprep.subr.bf16.mxu1 %v3392_v25 }
 0x699   :  { %3263 = vmatpush3.bf16.msra.mxu1 %v3392_v25 }
 0x69a   :  { %3264 = vmatprep.subr.bf16.mxu1 %v3393_v26 }
 0x69d   :  { %3265 = vmatpush3.bf16.msra.mxu1 %v3393_v26 }
 0x69e   :  { %3266 = vmatprep.subr.bf16.mxu1 %v3394_v27 }
 0x6a1   :  { %3267 = vmatpush3.bf16.msra.mxu1 %v3394_v27 }
 0x6a2   :  { %3268 = vmatprep.subr.bf16.mxu1 %v3395_v28 }
 0x6a5   :  { %3269 = vmatpush3.bf16.msra.mxu1 %v3395_v28 }
 0x6a6   :  { %3294 = vmatprep.subr.bf16.mxu1 %v3397_v30 }
 0x71c   :  { %v787_v53 = vpop.xlane.xlu0 %786 }
 0x71d   :  { %v794_v54 = vmul.f32 0.0078125, %v787_v53 }
 0x71e   :  { %v789_v55 = vpop.xlane.xlu1 %788 }
 0x71f   :  { %v798_v56 = vadd.f32 1e-05, %v794_v54  ;;  %v795_v57 = vmul.f32 0.0078125, %v789_v55 }
 0x720   :  { %v791_v58 = vpop.xlane.xlu0 %790 }
 0x721   :  { %3588 = vrsqrt.f32 %v798_v56  ;;  %v799_v59 = vadd.f32 1e-05, %v795_v57  ;;  %v796_v60 = vmul.f32 0.0078125, %v791_v58 }
 0x722   :  { %v793_v61 = vpop.xlane.xlu1 %792 }
 0x723   :  { %3590 = vrsqrt.f32 %v799_v59  ;;  %v800_v62 = vadd.f32 1e-05, %v796_v60  ;;  %v797_v63 = vmul.f32 0.0078125, %v793_v61 }
 0x725   :  { %3592 = vrsqrt.f32 %v800_v62  ;;  %v801_v0 = vadd.f32 1e-05, %v797_v63 }
 0x727   :  { %3594 = vrsqrt.f32 %v801_v0 }
 0x72b   :  { %v3589_v1 = vpop.eup %3588 }
 0x72c   :  { %v806_v51 = vmul.f32 %v3589_v1, %v778_v29  ;;  %v3396_v29 = vld [vmem:[#allocation2 + $0x18] ss:$84 sps:$4 sm:$0xff]  }
 0x72d   :  { %v3591_v3 = vpop.eup %3590  ;;  %3274 = vmatprep.subr.bf16.mxu0 %v3396_v29 }
 0x72e   :  { %v807_v4 = vmul.f32 %v3591_v3, %v779_v32  ;;  %v816_v5 = vmul.f32 %v2938_v2, %v806_v51  ;;  %v3400_v32 = vld [vmem:[#allocation2 + $0x168] ss:$84 sps:$4 sm:$0xff]  }
 0x72f   :  { %v3593_v6 = vpop.eup %3592 }
 0x730   :  { %v808_v8 = vmul.f32 %v3593_v6, %v780_v36  ;;  %v817_v9 = vmul.f32 %v2938_v2, %v807_v4  ;;  %v3849_v12 = vadd.f32 %v2939_v7, %v816_v5  ;;  %v2940_v36 = vld [vmem:[%s4176_s4 + $0x8] ss:$0 sm:$0xff]  ;;  %v3399_v4 = vld [vmem:[#allocation2 + $0xc4] ss:$84 sps:$4 sm:$0xff]   ;;  %v3401_v5 = vld [vmem:[#allocation2 + $0x16c] ss:$84 sps:$4 sm:$0xff]  }
 0x731   :  { %v3595_v10 = vpop.eup %3594  ;;  %v3403_v6 = vld [vmem:[#allocation2 + $0x214] ss:$84 sps:$4 sm:$0xff]  }
 0x732   :  { %v809_v11 = vmul.f32 %v3595_v10, %v781_v39  ;;  %v3851_v13 = vadd.f32 %v2939_v7, %v817_v9  ;;  %v818_v14 = vmul.f32 %v2938_v2, %v808_v8  ;;  %v3407_v8 = vld [vmem:[#allocation2 + $0x364] ss:$84 sps:$4 sm:$0xff]   ;;  %v3408_v9 = vld [vmem:[#allocation2 + $0x408] ss:$84 sps:$4 sm:$0xff]   ;;  %v3409_v10 = vld [vmem:[#allocation2 + $0x40c] ss:$84 sps:$4 sm:$0xff]  }
 0x734   :  { %v830_v15 = vpack.c.bf16 %v3851_v13, %v3849_v12  ;;  %v819_v17 = vmul.f32 %v2938_v2, %v809_v11  ;;  %v3855_v18 = vadd.f32 %v2939_v7, %v818_v14  ;;  %v3410_v11 = vld [vmem:[#allocation2 + $0x4b0] ss:$84 sps:$4 sm:$0xff]   ;;  %v3411_v14 = vld [vmem:[#allocation2 + $0x4b4] ss:$84 sps:$4 sm:$0xff]  }
 0x736   :  { %3250 = vmatprep.mubr.bf16.mxu0 %v830_v15  ;;  %v3857_v19 = vadd.f32 %v2939_v7, %v819_v17  ;;  %v3405_v7 = vld [vmem:[#allocation2 + $0x2bc] ss:$84 sps:$4 sm:$0xff]   ;;  %v3412_v15 = vld [vmem:[#allocation2 + $0x20] ss:$84 sps:$4 sm:$0xff]   ;;  %v2949_v17 = vld [vmem:[%s4176_s4 + $0x9] ss:$0 sm:$0xff] }
 0x738   :  { %v831_v20 = vpack.c.bf16 %v3857_v19, %v3855_v18 }
 0x73a   :  { %3251 = vmatmul.mubr.bf16.vlgmr.msra.gmra.mrb[16].mxu0 %v831_v20 }
 0x73b   :  { %3275 = vmatpush3.bf16.msra.mxu0 %v3396_v29 }
 0x73c   :  { %3276 = vmatprep.subr.bf16.mxu0 %v3398_v31 }
 0x73f   :  { %3277 = vmatpush3.bf16.msra.mxu0 %v3398_v31 }
 0x740   :  { %3278 = vmatprep.subr.bf16.mxu0 %v3400_v32 }
 0x743   :  { %3279 = vmatpush3.bf16.msra.mxu0 %v3400_v32 }
 0x744   :  { %3280 = vmatprep.subr.bf16.mxu0 %v3402_v33 }
 0x747   :  { %3281 = vmatpush3.bf16.msra.mxu0 %v3402_v33 }
 0x748   :  { %3282 = vmatprep.subr.bf16.mxu0 %v3404_v34 }
 0x74b   :  { %3283 = vmatpush3.bf16.msra.mxu0 %v3404_v34 }
 0x74c   :  { %3284 = vmatprep.subr.bf16.mxu0 %v3406_v35 }
 0x74f   :  { %3285 = vmatpush3.bf16.msra.mxu0 %v3406_v35 }
 0x750   :  { %3286 = vmatprep.subr.bf16.mxu0 %v3408_v9 }
 0x753   :  { %3287 = vmatpush3.bf16.msra.mxu0 %v3408_v9  ;;  %v3875_v9 = vld [vmem:[#allocation2 + $0x40] ss:$84 sps:$4 sm:$0xff]  }
 0x754   :  { %3288 = vmatprep.subr.bf16.mxu0 %v3410_v11 }
 0x757   :  { %3289 = vmatpush3.bf16.msra.mxu0 %v3410_v11 }
 0x758   :  { %3314 = vmatprep.subr.bf16.mxu0 %v3412_v15 }
 0x80d   :  { %v3252_v37 = vpop.f32.mrb[16].mxu0 }
 0x80e   :  { %v946_v38 = vadd.f32 %v3252_v37, %v2940_v36  ;;  %v937_v39 = vpop.f32.mrb[17].mxu0  ;;  %v3414_v37 = vld [vmem:[#allocation2 + $0x170] ss:$84 sps:$4 sm:$0xff]  }
 0x80f   :  { %v938_v40 = vadd.f32 %v2940_v36, %v937_v39  ;;  %v3253_v42 = vpop.f32.mrb[18].mxu0  ;;  %v3422_v39 = vld [vmem:[#allocation2 + $0x28] ss:$84 sps:$4 sm:$0xff]  }
 0x810   :  { %v958_v43 = vmul.f32 0.70710677, %v946_v38  ;;  %v949_v44 = vadd.f32 %v3253_v42, %v2940_v36  ;;  %v940_v45 = vpop.f32.mrb[19].mxu0  ;;  %v954_v57 = vmul.f32 0.5, %v946_v38  ;;  %v3419_v38 = vld [vmem:[#allocation2 + $0x4b8] ss:$84 sps:$4 sm:$0xff]  }
 0x811   :  { %v956_v46 = vmul.f32 0.70710677, %v938_v40  ;;  %v941_v47 = vadd.f32 %v2940_v36, %v940_v45  ;;  %v952_v60 = vmul.f32 0.5, %v938_v40  ;;  %v3413_v36 = vld [vmem:[#allocation2 + $0xc8] ss:$84 sps:$4 sm:$0xff]  }
 0x812   :  { %3596 = verf.f32 %v958_v43  ;;  %v959_v48 = vmul.f32 0.70710677, %v949_v44  ;;  %v955_v58 = vmul.f32 0.5, %v949_v44  ;;  %v3425_v40 = vld [vmem:[#allocation2 + $0x30] ss:$84 sps:$4 sm:$0xff]  }
 0x813   :  { %3598 = verf.f32 %v956_v46  ;;  %v957_v49 = vmul.f32 0.70710677, %v941_v47  ;;  %v953_v61 = vmul.f32 0.5, %v941_v47  ;;  %v3420_v42 = vld [vmem:[#allocation2 + $0x24] ss:$84 sps:$4 sm:$0xff]  }
 0x814   :  { %3600 = verf.f32 %v959_v48  ;;  %v3423_v43 = vld [vmem:[#allocation2 + $0x2c] ss:$84 sps:$4 sm:$0xff]   ;;  %v3428_v44 = vld [vmem:[#allocation2 + $0xd0] ss:$84 sps:$4 sm:$0xff]   ;;  %v3429_v47 = vld [vmem:[#allocation2 + $0xd4] ss:$84 sps:$4 sm:$0xff]  }
 0x815   :  { %3602 = verf.f32 %v957_v49  ;;  %v3431_v45 = vld [vmem:[#allocation2 + $0xd8] ss:$84 sps:$4 sm:$0xff]   ;;  %v3437_v49 = vld [vmem:[#allocation2 + $0x180] ss:$84 sps:$4 sm:$0xff]  }
 0x816   :  { %v3426_v46 = vld [vmem:[#allocation2 + $0xcc] ss:$84 sps:$4 sm:$0xff]  }
 0x817   :  { %v3434_v48 = vld [vmem:[#allocation2 + $0x178] ss:$84 sps:$4 sm:$0xff]  }
 0x81c   :  { %v3597_v50 = vpop.eup %3596 }
 0x81d   :  { %v3599_v52 = vpop.eup %3598  ;;  %v966_v53 = vadd.f32 1.0, %v3597_v50  ;;  %v3432_v50 = vld [vmem:[#allocation2 + $0x174] ss:$84 sps:$4 sm:$0xff]  }
 0x81e   :  { %v3601_v54 = vpop.eup %3600  ;;  %v964_v55 = vadd.f32 1.0, %v3599_v52  ;;  %v3435_v52 = vld [vmem:[#allocation2 + $0x17c] ss:$84 sps:$4 sm:$0xff]  }
 0x81f   :  { %v3603_v56 = vpop.eup %3602  ;;  %v967_v59 = vadd.f32 1.0, %v3601_v54  ;;  %v970_v63 = vmul.f32 %v966_v53, %v954_v57  ;;  %v3440_v53 = vld [vmem:[#allocation2 + $0x220] ss:$84 sps:$4 sm:$0xff]   ;;  %v3443_v54 = vld [vmem:[#allocation2 + $0x228] ss:$84 sps:$4 sm:$0xff]  }
 0x820   :  { %v965_v62 = vadd.f32 1.0, %v3603_v56  ;;  %v968_v1 = vmul.f32 %v964_v55, %v952_v60  ;;  %v3438_v55 = vld [vmem:[#allocation2 + $0x21c] ss:$84 sps:$4 sm:$0xff]   ;;  %v3441_v56 = vld [vmem:[#allocation2 + $0x224] ss:$84 sps:$4 sm:$0xff]  }
 0x821   :  { %v971_v0 = vmul.f32 %v967_v59, %v955_v58  ;;  %v3446_v57 = vld [vmem:[#allocation2 + $0x2c8] ss:$84 sps:$4 sm:$0xff]   ;;  %v3449_v58 = vld [vmem:[#allocation2 + $0x2d0] ss:$84 sps:$4 sm:$0xff]   ;;  %v3447_v60 = vld [vmem:[#allocation2 + $0x2cc] ss:$84 sps:$4 sm:$0xff]  }
 0x822   :  { %v969_v2 = vmul.f32 %v965_v62, %v953_v61  ;;  %v3444_v59 = vld [vmem:[#allocation2 + $0x2c4] ss:$84 sps:$4 sm:$0xff]  }
 0x823   :  { %v973_v51 = vpack.c.bf16 %v971_v0, %v970_v63  ;;  %v3452_v61 = vld [vmem:[#allocation2 + $0x370] ss:$84 sps:$4 sm:$0xff]   ;;  %v3455_v62 = vld [vmem:[#allocation2 + $0x378] ss:$84 sps:$4 sm:$0xff]   ;;  %v3453_v0 = vld [vmem:[#allocation2 + $0x374] ss:$84 sps:$4 sm:$0xff]  }
 0x824   :  { %v972_v3 = vpack.c.bf16 %v969_v2, %v968_v1  ;;  %v3450_v63 = vld [vmem:[#allocation2 + $0x36c] ss:$84 sps:$4 sm:$0xff]  }
 0x825   :  { %v3458_v1 = vld [vmem:[#allocation2 + $0x418] ss:$84 sps:$4 sm:$0xff]   ;;  %v3461_v2 = vld [vmem:[#allocation2 + $0x420] ss:$84 sps:$4 sm:$0xff]  }
 0x826   :  { %3270 = vmatprep.mubr.bf16.mxu1 %v972_v3  ;;  %v3459_v3 = vld [vmem:[#allocation2 + $0x41c] ss:$84 sps:$4 sm:$0xff]  }
 0x827   :  { %3271 = vmatmul.mubr.bf16.vlgmr.msra.gmra.mrb[16].mxu1 %v973_v51  ;;  %v3456_v51 = vld [vmem:[#allocation2 + $0x414] ss:$84 sps:$4 sm:$0xff]  }
 0x828   :  { %3295 = vmatpush3.bf16.msra.mxu1 %v3397_v30 }
 0x829   :  { %3296 = vmatprep.subr.bf16.mxu1 %v3399_v4 }
 0x82c   :  { %3297 = vmatpush3.bf16.msra.mxu1 %v3399_v4  ;;  %v3464_v4 = vld [vmem:[#allocation2 + $0x4c0] ss:$84 sps:$4 sm:$0xff]  }
 0x82d   :  { %3298 = vmatprep.subr.bf16.mxu1 %v3401_v5 }
 0x830   :  { %3299 = vmatpush3.bf16.msra.mxu1 %v3401_v5  ;;  %v3467_v5 = vld [vmem:[#allocation2 + $0x4c8] ss:$84 sps:$4 sm:$0xff]  }
 0x831   :  { %3300 = vmatprep.subr.bf16.mxu1 %v3403_v6 }
 0x834   :  { %3301 = vmatpush3.bf16.msra.mxu1 %v3403_v6  ;;  %v3462_v6 = vld [vmem:[#allocation2 + $0x4bc] ss:$84 sps:$4 sm:$0xff]  }
 0x835   :  { %3302 = vmatprep.subr.bf16.mxu1 %v3405_v7 }
 0x838   :  { %3303 = vmatpush3.bf16.msra.mxu1 %v3405_v7  ;;  %v3465_v7 = vld [vmem:[#allocation2 + $0x4c4] ss:$84 sps:$4 sm:$0xff]  }
 0x839   :  { %3304 = vmatprep.subr.bf16.mxu1 %v3407_v8 }
 0x83c   :  { %3305 = vmatpush3.bf16.msra.mxu1 %v3407_v8  ;;  %v3873_v8 = vld [vmem:[#allocation2 + $0x38] ss:$84 sps:$4 sm:$0xff]  }
 0x83d   :  { %3306 = vmatprep.subr.bf16.mxu1 %v3409_v10 }
 0x840   :  { %3307 = vmatpush3.bf16.msra.mxu1 %v3409_v10 }
 0x841   :  { %3308 = vmatprep.subr.bf16.mxu1 %v3411_v14 }
 0x844   :  { %3309 = vmatpush3.bf16.msra.mxu1 %v3411_v14 }
 0x845   :  { %1778 = vmatprep.subr.bf16.mxu1 %v3422_v39 }
 0x8fa   :  { %v3272_v20 = vpop.f32.mrb[16].mxu1 }
 0x8fb   :  { %v1088_v21 = vadd.f32 %v3272_v20, %v2949_v17  ;;  %v1079_v16 = vpop.f32.mrb[17].mxu1 }
 0x8fc   :  { %v1080_v25 = vadd.f32 %v2949_v17, %v1079_v16  ;;  %v3273_v26 = vpop.f32.mrb[18].mxu1 }
 0x8fd   :  { %v1091_v27 = vadd.f32 %v3273_v26, %v2949_v17  ;;  %v1082_v28 = vpop.f32.mrb[19].mxu1  ;;  %v1096_v30 = vadd.f32 %v1088_v21, %v3855_v18  ;;  %v3415_v18 = vld [vmem:[#allocation2 + $0x218] ss:$84 sps:$4 sm:$0xff]  }
 0x8fe   :  { %v1083_v29 = vadd.f32 %v2949_v17, %v1082_v28  ;;  %v1094_v32 = vadd.f32 %v1080_v25, %v3849_v12  ;;  %v3416_v12 = vld [vmem:[#allocation2 + $0x2c0] ss:$84 sps:$4 sm:$0xff]  }
 0x8ff   :  { %v1097_v31 = vadd.f32 %v1091_v27, %v3857_v19  ;;  %v3418_v19 = vld [vmem:[#allocation2 + $0x410] ss:$84 sps:$4 sm:$0xff]  }
 0x900   :  { %v1095_v33 = vadd.f32 %v1083_v29, %v3851_v13  ;;  %v3417_v13 = vld [vmem:[#allocation2 + $0x368] ss:$84 sps:$4 sm:$0xff]  }
 0x901   :  { %v1099_v34 = vpack.c.bf16 %v1097_v31, %v1096_v30 }
 0x902   :  { %v1098_v35 = vpack.c.bf16 %v1095_v33, %v1094_v32 }
 0x904   :  { %3290 = vmatprep.mubr.bf16.mxu0 %v1098_v35  ;;  %3310 = vmatprep.mubr.bf16.mxu1 %v1098_v35 }
 0x905   :  { %3291 = vmatmul.mubr.bf16.vlgmr.msra.gmra.mrb[20].mxu0 %v1099_v34  ;;  %3311 = vmatmul.mubr.bf16.vlgmr.msra.gmra.mrb[20].mxu1 %v1099_v34 }
 0x906   :  { %3315 = vmatpush3.bf16.msra.mxu0 %v3412_v15  ;;  %3330 = vmatprep.mubr.bf16.mxu0 %v1098_v35 }
 0x907   :  { %3316 = vmatprep.subr.bf16.mxu0 %v3413_v36  ;;  %1810 = vmatprep.mubr.bf16.mxu1 %v3695_v41 }
 0x908   :  { %1779 = vmatpush1.bf16.msra.mxu1 %v3420_v42 }
 0x909   :  { %1780 = vmatprep.subr.bf16.mxu1 %v3428_v44 }
 0x90a   :  { %3317 = vmatpush3.bf16.msra.mxu0 %v3413_v36 }
 0x90b   :  { %3318 = vmatprep.subr.bf16.mxu0 %v3414_v37 }
 0x90c   :  { %1781 = vmatpush1.bf16.msra.mxu1 %v3426_v46 }
 0x90d   :  { %1782 = vmatprep.subr.bf16.mxu1 %v3434_v48 }
 0x90e   :  { %3319 = vmatpush3.bf16.msra.mxu0 %v3414_v37 }
 0x90f   :  { %3320 = vmatprep.subr.bf16.mxu0 %v3415_v18 }
 0x910   :  { %1783 = vmatpush1.bf16.msra.mxu1 %v3432_v50 }
 0x911   :  { %1784 = vmatprep.subr.bf16.mxu1 %v3440_v53 }
 0x912   :  { %3321 = vmatpush3.bf16.msra.mxu0 %v3415_v18 }
 0x913   :  { %3322 = vmatprep.subr.bf16.mxu0 %v3416_v12 }
 0x914   :  { %1785 = vmatpush1.bf16.msra.mxu1 %v3438_v55 }
 0x915   :  { %1786 = vmatprep.subr.bf16.mxu1 %v3446_v57 }
 0x916   :  { %3323 = vmatpush3.bf16.msra.mxu0 %v3416_v12 }
 0x917   :  { %3324 = vmatprep.subr.bf16.mxu0 %v3417_v13 }
 0x918   :  { %1787 = vmatpush1.bf16.msra.mxu1 %v3444_v59 }
 0x919   :  { %1788 = vmatprep.subr.bf16.mxu1 %v3452_v61 }
 0x91a   :  { %3325 = vmatpush3.bf16.msra.mxu0 %v3417_v13 }
 0x91b   :  { %3326 = vmatprep.subr.bf16.mxu0 %v3418_v19 }
 0x91c   :  { %1789 = vmatpush1.bf16.msra.mxu1 %v3450_v63 }
 0x91d   :  { %1790 = vmatprep.subr.bf16.mxu1 %v3458_v1 }
 0x91e   :  { %3327 = vmatpush3.bf16.msra.mxu0 %v3418_v19 }
 0x91f   :  { %3328 = vmatprep.subr.bf16.mxu0 %v3419_v38 }
 0x920   :  { %1791 = vmatpush1.bf16.msra.mxu1 %v3456_v51 }
 0x921   :  { %1792 = vmatprep.subr.bf16.mxu1 %v3464_v4 }
 0x922   :  { %3329 = vmatpush3.bf16.msra.mxu0 %v3419_v38  ;;  %v2982_v38 = vld [vmem:[%s4176_s4 + $0xa] ss:$0 sm:$0xff] }
 0x923   :  { %1819 = vmatprep.subr.bf16.mxu0 %v3425_v40 }
 0x924   :  { %1793 = vmatpush1.bf16.msra.mxu1 %v3462_v6 }
 0x925   :  { %3331 = vmatmul.mubr.bf16.vlgmr.msra.gmra.mrb[24].mxu0 %v1099_v34  ;;  %2052 = vmatprep.subr.bf16.mxu1 %v3873_v8 }
 0x926   :  { %1851 = vmatprep.mubr.bf16.mxu0 %v3695_v41  ;;  %1820 = vmatpush1.bf16.msra.mxu0 %v3423_v43 }
 0x927   :  { %1821 = vmatprep.subr.bf16.mxu0 %v3431_v45 }
 0x92a   :  { %1822 = vmatpush1.bf16.msra.mxu0 %v3429_v47 }
 0x92b   :  { %1823 = vmatprep.subr.bf16.mxu0 %v3437_v49 }
 0x92e   :  { %1824 = vmatpush1.bf16.msra.mxu0 %v3435_v52 }
 0x92f   :  { %1825 = vmatprep.subr.bf16.mxu0 %v3443_v54 }
 0x932   :  { %1826 = vmatpush1.bf16.msra.mxu0 %v3441_v56 }
 0x933   :  { %1827 = vmatprep.subr.bf16.mxu0 %v3449_v58 }
 0x936   :  { %1828 = vmatpush1.bf16.msra.mxu0 %v3447_v60 }
 0x937   :  { %1829 = vmatprep.subr.bf16.mxu0 %v3455_v62 }
 0x93a   :  { %1830 = vmatpush1.bf16.msra.mxu0 %v3453_v0 }
 0x93b   :  { %1831 = vmatprep.subr.bf16.mxu0 %v3461_v2 }
 0x93e   :  { %1832 = vmatpush1.bf16.msra.mxu0 %v3459_v3 }
 0x93f   :  { %1833 = vmatprep.subr.bf16.mxu0 %v3467_v5 }
 0x942   :  { %1834 = vmatpush1.bf16.msra.mxu0 %v3465_v7 }
 0x943   :  { %2093 = vmatprep.subr.bf16.mxu0 %v3875_v9 }
 0x9d8   :  { %v3292_v10 = vpop.f32.mrb[20].mxu0  ;;  %v3312_v11 = vpop.f32.mrb[20].mxu1 }
 0x9d9   :  { %v1198_v14 = vpop.f32.mrb[21].mxu0  ;;  %v1311_v15 = vpop.f32.mrb[21].mxu1  ;;  %v1470_v21 = vrot.slane %v3312_v11, 1 }
 0x9da   :  { %v3293_v17 = vpop.f32.mrb[22].mxu0  ;;  %v3313_v20 = vpop.f32.mrb[22].mxu1  ;;  %v1443_v27 = vrot.slane %v1311_v15, 1 }
 0x9db   :  { %v1471_v16 = vrot.slane %v3313_v20, 1  ;;  %v1201_v25 = vpop.f32.mrb[23].mxu0  ;;  %v1314_v26 = vpop.f32.mrb[23].mxu1 }
 0x9dc   :  { %v1444_v28 = vrot.slane %v1314_v26, 1 }
 0x9dd   :  { %v1472_v29 = vsel %vm1442_vm6, %v1470_v21, %v1471_v16  ;;  %v1476_v30 = vadd.f32 %v3293_v17, %v1471_v16 }
 0x9de   :  { %v1475_v31 = vadd.f32 %v3292_v10, %v1472_v29  ;;  %v1445_v32 = vsel %vm1442_vm6, %v1443_v27, %v1444_v28  ;;  %v1449_v33 = vadd.f32 %v1444_v28, %v1201_v25 }
 0x9df   :  { %v1448_v34 = vadd.f32 %v1445_v32, %v1198_v14 }
 0x9f8   :  { %v3332_v35 = vpop.f32.mrb[24].mxu0 }
 0x9f9   :  { %v1424_v36 = vpop.f32.mrb[25].mxu0  ;;  %v1479_v18 = vrot.slane %v3332_v35, 2 }
 0x9fa   :  { %v3333_v37 = vpop.f32.mrb[26].mxu0  ;;  %v1453_v19 = vrot.slane %v1424_v36, 2 }
 0x9fb   :  { %v1480_v12 = vrot.slane %v3333_v37, 2  ;;  %v1427_v13 = vpop.f32.mrb[27].mxu0 }
 0x9fc   :  { %v1454_v39 = vrot.slane %v1427_v13, 2 }
 0x9fd   :  { %v1481_v40 = vsel %vm1452_vm7, %v1479_v18, %v1480_v12  ;;  %v1485_v42 = vadd.f32 %v1480_v12, %v1476_v30 }
 0x9fe   :  { %v1484_v43 = vadd.f32 %v1481_v40, %v1475_v31  ;;  %v1455_v44 = vsel %vm1452_vm7, %v1453_v19, %v1454_v39  ;;  %v1459_v45 = vadd.f32 %v1454_v39, %v1449_v33 }
 0x9ff   :  { %v1487_v46 = vadd.f32 %v2982_v38, %v1485_v42  ;;  %v1458_v47 = vadd.f32 %v1455_v44, %v1448_v34 }
 0xa00   :  { %v1486_v48 = vadd.f32 %v2982_v38, %v1484_v43  ;;  %v1467_v53 = vadd.f32 %v2982_v38, %v1459_v45 }
 0xa01   :  { %v1530_v49 = vsel %vm1520_vm9, %v1487_v46, -inf  ;;  %v1546_v50 = vsel %vm1538_vm10, %v1487_v46, -inf  ;;  %v1466_v52 = vadd.f32 %v2982_v38, %v1458_v47 }
 0xa02   :  { %v1496_v54 = vsel %vm1488_vm8, %v1486_v48, -inf  ;;  %v1511_v55 = vsel %vm1503_vm11, %v1486_v48, -inf  ;;  %v1529_v56 = vsel %vm1518_vm12, %v1486_v48, -inf  ;;  %v1547_v57 = vrot.slane %v1546_v50, 4 }
 0xa03   :  { %v1497_v58 = vrot.slane %v1496_v54, 4  ;;  %v1512_v59 = vrot.slane %v1511_v55, 4  ;;  %v1531_v60 = vmax.f32 %v1529_v56, %v1530_v49  ;;  %v1489_v61 = vsel %vm1488_vm8, %v1466_v52, -inf }
 0xa04   :  { %v1490_v62 = vrot.slane %v1489_v61, 4  ;;  %v1504_v63 = vsel %vm1503_vm11, %v1466_v52, -inf  ;;  %v1519_v0 = vsel %vm1518_vm12, %v1466_v52, -inf  ;;  %v1548_v4 = vmax.f32 %v1546_v50, %v1547_v57 }
 0xa05   :  { %v1498_v1 = vmax.f32 %v1496_v54, %v1497_v58  ;;  %v1513_v2 = vmax.f32 %v1511_v55, %v1512_v59  ;;  %v1532_v51 = vrot.slane %v1531_v60, 4  ;;  %v1505_v3 = vrot.slane %v1504_v63, 4 }
 0xa06   :  { %v1491_v5 = vmax.f32 %v1489_v61, %v1490_v62  ;;  %v1521_v6 = vsel %vm1520_vm9, %v1467_v53, -inf  ;;  %v1539_v7 = vsel %vm1538_vm10, %v1467_v53, -inf  ;;  %v1549_v32 = vrot.slane %v1548_v4, 2  ;;  %v3901_v61 = vld [vmem:[#allocation2 + $0x34] ss:$84 sps:$4 sm:$0xff]  }
 0xa07   :  { %v1499_v10 = vrot.slane %v1498_v1, 2  ;;  %v1514_v11 = vrot.slane %v1513_v2, 2  ;;  %v1533_v14 = vmax.f32 %v1531_v60, %v1532_v51  ;;  %v1506_v15 = vmax.f32 %v1504_v63, %v1505_v3  ;;  %v3903_v62 = vld [vmem:[#allocation2 + $0x3c] ss:$84 sps:$4 sm:$0xff]   ;;  %v3913_v51 = vld [vmem:[#allocation2 + $0xe4] ss:$84 sps:$4 sm:$0xff]  }
 0xa08   :  { %v1492_v17 = vrot.slane %v1491_v5, 2  ;;  %v1522_v20 = vmax.f32 %v1519_v0, %v1521_v6  ;;  %v1540_v21 = vrot.slane %v1539_v7, 4  ;;  %v1550_v40 = vmax.f32 %v1548_v4, %v1549_v32  ;;  %v3905_v0 = vld [vmem:[#allocation2 + $0xe0] ss:$84 sps:$4 sm:$0xff]   ;;  %v3917_v3 = vld [vmem:[#allocation2 + $0x188] ss:$84 sps:$4 sm:$0xff]  }
 0xa09   :  { %v1500_v16 = vmax.f32 %v1498_v1, %v1499_v10  ;;  %v1515_v25 = vmax.f32 %v1513_v2, %v1514_v11  ;;  %v1534_v26 = vrot.slane %v1533_v14, 2  ;;  %v1507_v27 = vrot.slane %v1506_v15, 2  ;;  %v3907_v1 = vld [vmem:[#allocation2 + $0xe8] ss:$84 sps:$4 sm:$0xff]   ;;  %v3919_v4 = vld [vmem:[#allocation2 + $0x190] ss:$84 sps:$4 sm:$0xff]  }
 0xa0a   :  { %v1493_v28 = vmax.f32 %v1491_v5, %v1492_v17  ;;  %v1523_v29 = vrot.slane %v1522_v20, 4  ;;  %v1541_v30 = vmax.f32 %v1539_v7, %v1540_v21  ;;  %v1551_v52 = vrot.slane %v1550_v40, 1  ;;  %v3911_v2 = vld [vmem:[#allocation2 + $0xdc] ss:$84 sps:$4 sm:$0xff]   ;;  %v3925_v5 = vld [vmem:[#allocation2 + $0x184] ss:$84 sps:$4 sm:$0xff]  }
 0xa0b   :  { %v1501_v31 = vrot.slane %v1500_v16, 1  ;;  %v1508_v33 = vmax.f32 %v1506_v15, %v1507_v27  ;;  %v1516_v34 = vrot.slane %v1515_v25, 1  ;;  %v1535_v12 = vmax.f32 %v1533_v14, %v1534_v26  ;;  %v3927_v6 = vld [vmem:[#allocation2 + $0x18c] ss:$84 sps:$4 sm:$0xff]   ;;  %v3931_v7 = vld [vmem:[#allocation2 + $0x230] ss:$84 sps:$4 sm:$0xff]  }
 0xa0c   :  { %v1494_v35 = vrot.slane %v1493_v28, 1  ;;  %v1524_v36 = vmax.f32 %v1522_v20, %v1523_v29  ;;  %v1542_v37 = vrot.slane %v1541_v30, 2  ;;  %v1552_v57 = vmax.f32 %v1550_v40, %v1551_v52  ;;  %v3933_v10 = vld [vmem:[#allocation2 + $0x238] ss:$84 sps:$4 sm:$0xff]   ;;  %v3939_v14 = vld [vmem:[#allocation2 + $0x234] ss:$84 sps:$4 sm:$0xff]  }
 0xa0d   :  { %v1502_v18 = vmax.f32 %v1500_v16, %v1501_v31  ;;  %v1509_v13 = vrot.slane %v1508_v33, 1  ;;  %v1517_v43 = vmax.f32 %v1515_v25, %v1516_v34  ;;  %v1536_v46 = vrot.slane %v1535_v12, 1  ;;  %v3937_v11 = vld [vmem:[#allocation2 + $0x22c] ss:$84 sps:$4 sm:$0xff]   ;;  %v3949_v20 = vld [vmem:[#allocation2 + $0x2d4] ss:$84 sps:$4 sm:$0xff]  }
 0xa0e   :  { %v1495_v19 = vmax.f32 %v1493_v28, %v1494_v35  ;;  %v1525_v38 = vrot.slane %v1524_v36, 2  ;;  %v1543_v39 = vmax.f32 %v1541_v30, %v1542_v37  ;;  %v3943_v15 = vld [vmem:[#allocation2 + $0x2d8] ss:$84 sps:$4 sm:$0xff]   ;;  %v3945_v17 = vld [vmem:[#allocation2 + $0x2e0] ss:$84 sps:$4 sm:$0xff]  }
 0xa0f   :  { %v1510_v42 = vmax.f32 %v1508_v33, %v1509_v13  ;;  %v1537_v54 = vmax.f32 %v1535_v12, %v1536_v46  ;;  %v3951_v21 = vld [vmem:[#allocation2 + $0x2dc] ss:$84 sps:$4 sm:$0xff]   ;;  %v3955_v16 = vld [vmem:[#allocation2 + $0x380] ss:$84 sps:$4 sm:$0xff]   ;;  %v3963_v27 = vld [vmem:[#allocation2 + $0x384] ss:$84 sps:$4 sm:$0xff]  }
 0xa10   :  { %v1526_v44 = vmax.f32 %v1524_v36, %v1525_v38  ;;  %v1553_v45 = vsel %vm1520_vm9, %v1495_v19, %v1502_v18  ;;  %v1544_v49 = vrot.slane %v1543_v39, 1  ;;  %v3957_v25 = vld [vmem:[#allocation2 + $0x388] ss:$84 sps:$4 sm:$0xff]   ;;  %v3969_v29 = vld [vmem:[#allocation2 + $0x430] ss:$84 sps:$4 sm:$0xff]  }
 0xa11   :  { %v1555_v47 = vsel %vm1554_vm13, %v1553_v45, %v1510_v42  ;;  %v3961_v26 = vld [vmem:[#allocation2 + $0x37c] ss:$84 sps:$4 sm:$0xff]   ;;  %v3973_v30 = vld [vmem:[#allocation2 + $0x424] ss:$84 sps:$4 sm:$0xff]   ;;  %v3975_v31 = vld [vmem:[#allocation2 + $0x42c] ss:$84 sps:$4 sm:$0xff]  }
 0xa12   :  { %v1527_v48 = vrot.slane %v1526_v44, 1  ;;  %v1556_v50 = vsel %vm1488_vm8, %v1555_v47, %v1517_v43  ;;  %v1545_v55 = vmax.f32 %v1543_v39, %v1544_v49  ;;  %v3967_v28 = vld [vmem:[#allocation2 + $0x428] ss:$84 sps:$4 sm:$0xff]   ;;  %v3979_v32 = vld [vmem:[#allocation2 + $0x4d0] ss:$84 sps:$4 sm:$0xff]  }
 0xa13   :  { %v3981_v33 = vld [vmem:[#allocation2 + $0x4d8] ss:$84 sps:$4 sm:$0xff]   ;;  %v3987_v35 = vld [vmem:[#allocation2 + $0x4d4] ss:$84 sps:$4 sm:$0xff]  }
 0xa14   :  { %v1528_v53 = vmax.f32 %v1526_v44, %v1527_v48  ;;  %v3985_v34 = vld [vmem:[#allocation2 + $0x4cc] ss:$84 sps:$4 sm:$0xff]   ;;  %v4037_v44 = vsub.s32 3, %v3794_v22 }
 0xa15   :  { %v1596_v40 = vld [vmem:[%s4176_s4 + $0xb] sm:$0xf] }
 0xa16   :  { %v1558_v56 = vsel %vm1557_vm14, %v1556_v50, %v1528_v53  ;;  %v1601_v42 = vrot.slane %v1596_v40, %v3797_v24  ;;  %v1605_v43 = vrot.slane %v1596_v40, %v3803_v23  ;;  %v1613_v53 = vrot.slane %v1596_v40, %v4037_v44 }
 0xa17   :  { %v1560_v58 = vsel %vm1559_vm15, %v1558_v56, %v1537_v54 }
 0xa18   :  { %v1561_v59 = vsel %vm1452_vm7, %v1560_v58, %v1545_v55 }
 0xa19   :  { %v1562_v60 = vsel %vm1442_vm6, %v1561_v59, %v1552_v57  ;;  %v4047_v57 = vsub.s32 2, %v3794_v22 }
 0xa1a   :  { %v1563_v63 = vpack.c.bf16 %v1562_v60, %v1562_v60 }
 0xa1c   :  { %1811 = vmatmul.mubr.bf16.vlgmr.msra.gmra.mrb[24].mxu1 %v1563_v63  ;;  %1852 = vmatmul.mubr.bf16.vlgmr.msra.gmra.mrb[28].mxu0 %v1563_v63 }
 0xa1d   :  { %2053 = vmatpush1.bf16.msra.mxu1 %v3901_v61  ;;  %2094 = vmatpush1.bf16.msra.mxu0 %v3903_v62 }
 0xa1e   :  { %2054 = vmatprep.subr.bf16.mxu1 %v3905_v0  ;;  %2095 = vmatprep.subr.bf16.mxu0 %v3907_v1 }
 0xa1f   :  { %2084 = vmatprep.mubr.bf16.mxu1 %v3695_v41  ;;  %2125 = vmatprep.mubr.bf16.mxu0 %v3695_v41 }
 0xa21   :  { %2055 = vmatpush1.bf16.msra.mxu1 %v3911_v2  ;;  %2096 = vmatpush1.bf16.msra.mxu0 %v3913_v51 }
 0xa22   :  { %2056 = vmatprep.subr.bf16.mxu1 %v3917_v3  ;;  %2097 = vmatprep.subr.bf16.mxu0 %v3919_v4 }
 0xa25   :  { %2057 = vmatpush1.bf16.msra.mxu1 %v3925_v5  ;;  %2098 = vmatpush1.bf16.msra.mxu0 %v3927_v6 }
 0xa26   :  { %2058 = vmatprep.subr.bf16.mxu1 %v3931_v7  ;;  %2099 = vmatprep.subr.bf16.mxu0 %v3933_v10 }
 0xa29   :  { %2059 = vmatpush1.bf16.msra.mxu1 %v3937_v11  ;;  %2100 = vmatpush1.bf16.msra.mxu0 %v3939_v14 }
 0xa2a   :  { %2060 = vmatprep.subr.bf16.mxu1 %v3943_v15  ;;  %2101 = vmatprep.subr.bf16.mxu0 %v3945_v17 }
 0xa2d   :  { %2061 = vmatpush1.bf16.msra.mxu1 %v3949_v20  ;;  %2102 = vmatpush1.bf16.msra.mxu0 %v3951_v21 }
 0xa2e   :  { %2062 = vmatprep.subr.bf16.mxu1 %v3955_v16  ;;  %2103 = vmatprep.subr.bf16.mxu0 %v3957_v25 }
 0xa31   :  { %2063 = vmatpush1.bf16.msra.mxu1 %v3961_v26  ;;  %2104 = vmatpush1.bf16.msra.mxu0 %v3963_v27 }
 0xa32   :  { %2064 = vmatprep.subr.bf16.mxu1 %v3967_v28  ;;  %2105 = vmatprep.subr.bf16.mxu0 %v3969_v29 }
 0xa35   :  { %2065 = vmatpush1.bf16.msra.mxu1 %v3973_v30  ;;  %2106 = vmatpush1.bf16.msra.mxu0 %v3975_v31 }
 0xa36   :  { %2066 = vmatprep.subr.bf16.mxu1 %v3979_v32  ;;  %2107 = vmatprep.subr.bf16.mxu0 %v3981_v33 }
 0xa39   :  { %2067 = vmatpush1.bf16.msra.mxu1 %v3985_v34  ;;  %2108 = vmatpush1.bf16.msra.mxu0 %v3987_v35 }
 0xa3a   :  { %2163 = vmatprep.subr.bf16.mxu1 %v3873_v8  ;;  %2204 = vmatprep.subr.bf16.mxu0 %v3875_v9 }
 0xa3c   :  { %2085 = vmatmul.mubr.bf16.vlgmr.msra.gmra.mrb[28].mxu1 %v3695_v41  ;;  %2126 = vmatmul.mubr.bf16.vlgmr.msra.gmra.mrb[32].mxu0 %v3695_v41 }
 0xa3d   :  { %2164 = vmatpush1.bf16.msra.mxu1 %v3901_v61  ;;  %2205 = vmatpush1.bf16.msra.mxu0 %v3903_v62 }
 0xa3e   :  { %2165 = vmatprep.subr.bf16.mxu1 %v3905_v0  ;;  %2206 = vmatprep.subr.bf16.mxu0 %v3907_v1 }
 0xa3f   :  { %2195 = vmatprep.mubr.bf16.mxu1 %v3695_v41  ;;  %2236 = vmatprep.mubr.bf16.mxu0 %v3695_v41 }
 0xa41   :  { %2166 = vmatpush1.bf16.msra.mxu1 %v3911_v2  ;;  %2207 = vmatpush1.bf16.msra.mxu0 %v3913_v51 }
 0xa42   :  { %2167 = vmatprep.subr.bf16.mxu1 %v3917_v3  ;;  %2208 = vmatprep.subr.bf16.mxu0 %v3919_v4 }
 0xa45   :  { %2168 = vmatpush1.bf16.msra.mxu1 %v3925_v5  ;;  %2209 = vmatpush1.bf16.msra.mxu0 %v3927_v6 }
 0xa46   :  { %2169 = vmatprep.subr.bf16.mxu1 %v3931_v7  ;;  %2210 = vmatprep.subr.bf16.mxu0 %v3933_v10 }
 0xa49   :  { %2170 = vmatpush1.bf16.msra.mxu1 %v3937_v11  ;;  %2211 = vmatpush1.bf16.msra.mxu0 %v3939_v14 }
 0xa4a   :  { %2171 = vmatprep.subr.bf16.mxu1 %v3943_v15  ;;  %2212 = vmatprep.subr.bf16.mxu0 %v3945_v17 }
 0xa4d   :  { %2172 = vmatpush1.bf16.msra.mxu1 %v3949_v20  ;;  %2213 = vmatpush1.bf16.msra.mxu0 %v3951_v21 }
 0xa4e   :  { %2173 = vmatprep.subr.bf16.mxu1 %v3955_v16  ;;  %2214 = vmatprep.subr.bf16.mxu0 %v3957_v25 }
 0xa51   :  { %2174 = vmatpush1.bf16.msra.mxu1 %v3961_v26  ;;  %2215 = vmatpush1.bf16.msra.mxu0 %v3963_v27 }
 0xa52   :  { %2175 = vmatprep.subr.bf16.mxu1 %v3967_v28  ;;  %2216 = vmatprep.subr.bf16.mxu0 %v3969_v29 }
 0xa55   :  { %2176 = vmatpush1.bf16.msra.mxu1 %v3973_v30  ;;  %2217 = vmatpush1.bf16.msra.mxu0 %v3975_v31 }
 0xa56   :  { %2177 = vmatprep.subr.bf16.mxu1 %v3979_v32  ;;  %2218 = vmatprep.subr.bf16.mxu0 %v3981_v33 }
 0xa59   :  { %2178 = vmatpush1.bf16.msra.mxu1 %v3985_v34  ;;  %2219 = vmatpush1.bf16.msra.mxu0 %v3987_v35 }
 0xa5a   :  { %2292 = vmatprep.subr.bf16.mxu1 %v3873_v8  ;;  %2333 = vmatprep.subr.bf16.mxu0 %v3875_v9 }
 0xaef   :  { %v1812_v36 = vpop.f32.mrb[24].mxu1  ;;  %v1853_v37 = vpop.f32.mrb[28].mxu0 }
 0xaf0   :  { %v1814_v18 = vpop.f32.mrb[25].mxu1  ;;  %v1855_v12 = vpop.f32.mrb[29].mxu0  ;;  %v4039_v45 = vadd.f32 %v1812_v36, %v1601_v42 }
 0xaf1   :  { %v1816_v13 = vpop.f32.mrb[26].mxu1  ;;  %v1857_v19 = vpop.f32.mrb[30].mxu0  ;;  %v4041_v46 = vadd.f32 %v1814_v18, %v1605_v43  ;;  %v4049_v36 = vadd.f32 %v1855_v12, %v1613_v53  ;;  %v1609_v18 = vrot.slane %v1596_v40, %v4047_v57 }
 0xaf2   :  { %v1817_v38 = vpop.f32.mrb[27].mxu1  ;;  %v1858_v39 = vpop.f32.mrb[31].mxu0 }
 0xaf3   :  { %v4053_v19 = vadd.f32 %v1853_v37, %v1609_v18 }
 0xb0f   :  { %v2086_v47 = vpop.f32.mrb[28].mxu1  ;;  %v2127_v48 = vpop.f32.mrb[32].mxu0 }
 0xb10   :  { %v2134_v49 = vadd.f32 %v2086_v47, %v4039_v45  ;;  %v2088_v50 = vpop.f32.mrb[29].mxu1  ;;  %v2129_v52 = vpop.f32.mrb[33].mxu0  ;;  %v2136_v39 = vadd.f32 %v2127_v48, %v4053_v19 }
 0xb11   :  { %v2135_v54 = vadd.f32 %v2088_v50, %v4041_v46  ;;  %v2090_v55 = vpop.f32.mrb[30].mxu1  ;;  %v2131_v56 = vpop.f32.mrb[34].mxu0  ;;  %v2137_v13 = vadd.f32 %v2129_v52, %v4049_v36 }
 0xb12   :  { %v3047_v58 = vmul.f32 -1.442695, %v2134_v49  ;;  %v2091_v59 = vpop.f32.mrb[31].mxu1  ;;  %v2132_v60 = vpop.f32.mrb[35].mxu0 }
 0xb13   :  { %v3048_v63 = vmul.f32 -1.442695, %v2135_v54  ;;  %v3049_v38 = vmul.f32 -1.442695, %v2137_v13 }
 0xb14   :  { %3604 = vpow2.f32 %v3047_v58 }
 0xb15   :  { %3606 = vpow2.f32 %v3048_v63 }
 0xb16   :  { %3608 = vpow2.f32 %v3049_v38 }
 0xb17   :  { %3610 = vtanh.f32 %v2136_v39 }
 0xb1e   :  { %v3605_v42 = vpop.eup %3604 }
 0xb1f   :  { %v3607_v22 = vpop.eup %3606  ;;  %v2141_v43 = vadd.f32 1.0, %v3605_v42 }
 0xb20   :  { %v2147_v47 = vadd.f32 1.0, %v3607_v22  ;;  %v3609_v12 = vpop.eup %3608 }
 0xb21   :  { %3612 = vrcp.f32 %v2141_v43  ;;  %v3611_v49 = vpop.eup %3610  ;;  %v2154_v54 = vadd.f32 1.0, %v3609_v12 }
 0xb22   :  { %3614 = vrcp.f32 %v2147_v47 }
 0xb23   :  { %3616 = vrcp.f32 %v2154_v54 }
 0xb2b   :  { %v3613_v50 = vpop.eup %3612 }
 0xb2c   :  { %v3615_v53 = vpop.eup %3614  ;;  %v2158_v40 = vmul.f32 %v3613_v50, %v3611_v49 }
 0xb2d   :  { %v2157_v52 = vmul.f32 0.0, %v3615_v53  ;;  %v3617_v48 = vpop.eup %3616 }
 0xb2f   :  { %v4056_v37 = vadd.f32 %v2158_v40, %v2157_v52 }
 0xb31   :  { %3618 = vtanh.f32 %v4056_v37 }
 0xb3b   :  { %v3619_v55 = vpop.eup %3618 }
 0xb3c   :  { %v2161_v56 = vmul.f32 %v3619_v55, %v3617_v48 }
 0xb3e   :  { %v2162_v58 = vpack.c.bf16 %v2161_v56, %v2161_v56 }
 0xb40   :  { %2196 = vmatmul.mubr.bf16.vlgmr.msra.gmra.mrb[32].mxu1 %v2162_v58  ;;  %2237 = vmatmul.mubr.bf16.vlgmr.msra.gmra.mrb[36].mxu0 %v2162_v58 }
 0xb41   :  { %2293 = vmatpush1.bf16.msra.mxu1 %v3901_v61  ;;  %2334 = vmatpush1.bf16.msra.mxu0 %v3903_v62 }
 0xb42   :  { %2294 = vmatprep.subr.bf16.mxu1 %v3905_v0  ;;  %2335 = vmatprep.subr.bf16.mxu0 %v3907_v1 }
 0xb43   :  { %2324 = vmatprep.mubr.bf16.mxu1 %v3695_v41  ;;  %2365 = vmatprep.mubr.bf16.mxu0 %v3695_v41 }
 0xb45   :  { %2295 = vmatpush1.bf16.msra.mxu1 %v3911_v2  ;;  %2336 = vmatpush1.bf16.msra.mxu0 %v3913_v51 }
 0xb46   :  { %2296 = vmatprep.subr.bf16.mxu1 %v3917_v3  ;;  %2337 = vmatprep.subr.bf16.mxu0 %v3919_v4 }
 0xb49   :  { %2297 = vmatpush1.bf16.msra.mxu1 %v3925_v5  ;;  %2338 = vmatpush1.bf16.msra.mxu0 %v3927_v6 }
 0xb4a   :  { %2298 = vmatprep.subr.bf16.mxu1 %v3931_v7  ;;  %2339 = vmatprep.subr.bf16.mxu0 %v3933_v10 }
 0xb4d   :  { %2299 = vmatpush1.bf16.msra.mxu1 %v3937_v11  ;;  %2340 = vmatpush1.bf16.msra.mxu0 %v3939_v14 }
 0xb4e   :  { %2300 = vmatprep.subr.bf16.mxu1 %v3943_v15  ;;  %2341 = vmatprep.subr.bf16.mxu0 %v3945_v17 }
 0xb51   :  { %2301 = vmatpush1.bf16.msra.mxu1 %v3949_v20  ;;  %2342 = vmatpush1.bf16.msra.mxu0 %v3951_v21 }
 0xb52   :  { %2302 = vmatprep.subr.bf16.mxu1 %v3955_v16  ;;  %2343 = vmatprep.subr.bf16.mxu0 %v3957_v25 }
 0xb55   :  { %2303 = vmatpush1.bf16.msra.mxu1 %v3961_v26  ;;  %2344 = vmatpush1.bf16.msra.mxu0 %v3963_v27 }
 0xb56   :  { %2304 = vmatprep.subr.bf16.mxu1 %v3967_v28  ;;  %2345 = vmatprep.subr.bf16.mxu0 %v3969_v29 }
 0xb59   :  { %2305 = vmatpush1.bf16.msra.mxu1 %v3973_v30  ;;  %2346 = vmatpush1.bf16.msra.mxu0 %v3975_v31 }
 0xb5a   :  { %2306 = vmatprep.subr.bf16.mxu1 %v3979_v32  ;;  %2347 = vmatprep.subr.bf16.mxu0 %v3981_v33 }
 0xb5d   :  { %2307 = vmatpush1.bf16.msra.mxu1 %v3985_v34  ;;  %2348 = vmatpush1.bf16.msra.mxu0 %v3987_v35 }
 0xb5e   :  { %2421 = vmatprep.subr.bf16.mxu1 %v3873_v8  ;;  %2462 = vmatprep.subr.bf16.mxu0 %v3875_v9 }
 0xc13   :  { %v2197_v59 = vpop.f32.mrb[32].mxu1  ;;  %v2238_v60 = vpop.f32.mrb[36].mxu0 }
 0xc14   :  { %v2249_v63 = vrot.slane %v2197_v59, 6  ;;  %v2199_v18 = vpop.f32.mrb[33].mxu1  ;;  %v2240_v13 = vpop.f32.mrb[37].mxu0  ;;  %v2251_v9 = vrot.slane %v2238_v60, 6 }
 0xc15   :  { %v2250_v38 = vrot.slane %v2199_v18, 6  ;;  %v2201_v39 = vpop.f32.mrb[34].mxu1  ;;  %v2242_v42 = vpop.f32.mrb[38].mxu0  ;;  %v2252_v53 = vrot.slane %v2240_v13, 6  ;;  %v2281_v18 = vrot.slane %v4056_v37, 6 }
 0xc16   :  { %v2257_v22 = vadd.f32 %v2249_v63, %v4039_v45  ;;  %v2202_v43 = vpop.f32.mrb[35].mxu1  ;;  %v2243_v47 = vpop.f32.mrb[39].mxu0  ;;  %v2259_v54 = vadd.f32 %v2251_v9, %v4053_v19 }
 0xc17   :  { %v2258_v12 = vadd.f32 %v2250_v38, %v4041_v46  ;;  %v2260_v8 = vadd.f32 %v2252_v53, %v4049_v36 }
 0xc18   :  { %v3050_v49 = vmul.f32 -1.442695, %v2257_v22 }
 0xc19   :  { %v3051_v50 = vmul.f32 -1.442695, %v2258_v12  ;;  %v3052_v40 = vmul.f32 -1.442695, %v2260_v8 }
 0xc1a   :  { %3620 = vpow2.f32 %v3050_v49 }
 0xc1b   :  { %3622 = vpow2.f32 %v3051_v50 }
 0xc1c   :  { %3624 = vpow2.f32 %v3052_v40 }
 0xc1d   :  { %3626 = vtanh.f32 %v2259_v54 }
 0xc24   :  { %v3621_v52 = vpop.eup %3620 }
 0xc25   :  { %v3623_v48 = vpop.eup %3622  ;;  %v2264_v55 = vadd.f32 1.0, %v3621_v52  ;;  %v3518_v52 = vld [vmem:[#allocation2 + $0x48] ss:$84 sps:$4 sm:$0xff]  }
 0xc26   :  { %v2270_v56 = vadd.f32 1.0, %v3623_v48  ;;  %v3625_v58 = vpop.eup %3624  ;;  %v3521_v48 = vld [vmem:[#allocation2 + $0x50] ss:$84 sps:$4 sm:$0xff]  }
 0xc27   :  { %3628 = vrcp.f32 %v2264_v55  ;;  %v3627_v59 = vpop.eup %3626  ;;  %v2277_v39 = vadd.f32 1.0, %v3625_v58  ;;  %v3516_v55 = vld [vmem:[#allocation2 + $0x44] ss:$84 sps:$4 sm:$0xff]  }
 0xc28   :  { %3630 = vrcp.f32 %v2270_v56  ;;  %v3519_v56 = vld [vmem:[#allocation2 + $0x4c] ss:$84 sps:$4 sm:$0xff]   ;;  %v3524_v58 = vld [vmem:[#allocation2 + $0xf0] ss:$84 sps:$4 sm:$0xff]  }
 0xc29   :  { %3632 = vrcp.f32 %v2277_v39  ;;  %v3528_v39 = vld [vmem:[#allocation2 + $0x194] ss:$84 sps:$4 sm:$0xff]  }
 0xc31   :  { %v3629_v63 = vpop.eup %3628 }
 0xc32   :  { %v3631_v13 = vpop.eup %3630  ;;  %v2284_v38 = vmul.f32 %v3629_v63, %v3627_v59  ;;  %v3527_v59 = vld [vmem:[#allocation2 + $0xf8] ss:$84 sps:$4 sm:$0xff]  }
 0xc33   :  { %v2283_v60 = vmul.f32 %v3631_v13, %v2281_v18  ;;  %v3633_v22 = vpop.eup %3632  ;;  %v3522_v63 = vld [vmem:[#allocation2 + $0xec] ss:$84 sps:$4 sm:$0xff]   ;;  %v3525_v18 = vld [vmem:[#allocation2 + $0xf4] ss:$84 sps:$4 sm:$0xff]  }
 0xc34   :  { %v3530_v13 = vld [vmem:[#allocation2 + $0x198] ss:$84 sps:$4 sm:$0xff]  }
 0xc35   :  { %v4098_v42 = vadd.f32 %v2284_v38, %v2283_v60  ;;  %v3533_v38 = vld [vmem:[#allocation2 + $0x1a0] ss:$84 sps:$4 sm:$0xff]  }
 0xc36   :  { %v3536_v60 = vld [vmem:[#allocation2 + $0x240] ss:$84 sps:$4 sm:$0xff]  }
 0xc37   :  { %3634 = vtanh.f32 %v4098_v42 }
 0xc41   :  { %v3635_v43 = vpop.eup %3634 }
 0xc42   :  { %v2287_v47 = vmul.f32 %v3635_v43, %v3633_v22  ;;  %v3534_v22 = vld [vmem:[#allocation2 + $0x23c] ss:$84 sps:$4 sm:$0xff]   ;;  %v3537_v43 = vld [vmem:[#allocation2 + $0x244] ss:$84 sps:$4 sm:$0xff]  }
 0xc44   :  { %v2288_v12 = vpack.c.bf16 %v2287_v47, %v2287_v47  ;;  %v3542_v47 = vld [vmem:[#allocation2 + $0x2e8] ss:$84 sps:$4 sm:$0xff]  }
 0xc46   :  { %v2290_v49 = vrot.slane %v2288_v12, 1  ;;  %v3540_v12 = vld [vmem:[#allocation2 + $0x2e4] ss:$84 sps:$4 sm:$0xff]  }
 0xc48   :  { %2325 = vmatmul.mubr.bf16.vlgmr.msra.gmra.mrb[36].mxu1 %v2290_v49  ;;  %2366 = vmatmul.mubr.bf16.vlgmr.msra.gmra.mrb[40].mxu0 %v2290_v49  ;;  %v3543_v49 = vld [vmem:[#allocation2 + $0x2ec] ss:$84 sps:$4 sm:$0xff]  }
 0xc49   :  { %2422 = vmatpush1.bf16.msra.mxu1 %v3901_v61  ;;  %2463 = vmatpush1.bf16.msra.mxu0 %v3903_v62 }
 0xc4a   :  { %2423 = vmatprep.subr.bf16.mxu1 %v3905_v0  ;;  %2464 = vmatprep.subr.bf16.mxu0 %v3907_v1 }
 0xc4b   :  { %2453 = vmatprep.mubr.bf16.mxu1 %v3695_v41  ;;  %2494 = vmatprep.mubr.bf16.mxu0 %v3695_v41 }
 0xc4d   :  { %2424 = vmatpush1.bf16.msra.mxu1 %v3911_v2  ;;  %2465 = vmatpush1.bf16.msra.mxu0 %v3913_v51 }
 0xc4e   :  { %2425 = vmatprep.subr.bf16.mxu1 %v3917_v3  ;;  %2466 = vmatprep.subr.bf16.mxu0 %v3919_v4 }
 0xc51   :  { %2426 = vmatpush1.bf16.msra.mxu1 %v3925_v5  ;;  %2467 = vmatpush1.bf16.msra.mxu0 %v3927_v6 }
 0xc52   :  { %2427 = vmatprep.subr.bf16.mxu1 %v3931_v7  ;;  %2468 = vmatprep.subr.bf16.mxu0 %v3933_v10 }
 0xc55   :  { %2428 = vmatpush1.bf16.msra.mxu1 %v3937_v11  ;;  %2469 = vmatpush1.bf16.msra.mxu0 %v3939_v14 }
 0xc56   :  { %2429 = vmatprep.subr.bf16.mxu1 %v3943_v15  ;;  %2470 = vmatprep.subr.bf16.mxu0 %v3945_v17 }
 0xc59   :  { %2430 = vmatpush1.bf16.msra.mxu1 %v3949_v20  ;;  %2471 = vmatpush1.bf16.msra.mxu0 %v3951_v21 }
 0xc5a   :  { %2431 = vmatprep.subr.bf16.mxu1 %v3955_v16  ;;  %2472 = vmatprep.subr.bf16.mxu0 %v3957_v25 }
 0xc5d   :  { %2432 = vmatpush1.bf16.msra.mxu1 %v3961_v26  ;;  %2473 = vmatpush1.bf16.msra.mxu0 %v3963_v27 }
 0xc5e   :  { %2433 = vmatprep.subr.bf16.mxu1 %v3967_v28  ;;  %2474 = vmatprep.subr.bf16.mxu0 %v3969_v29 }
 0xc61   :  { %2434 = vmatpush1.bf16.msra.mxu1 %v3973_v30  ;;  %2475 = vmatpush1.bf16.msra.mxu0 %v3975_v31 }
 0xc62   :  { %2435 = vmatprep.subr.bf16.mxu1 %v3979_v32  ;;  %2476 = vmatprep.subr.bf16.mxu0 %v3981_v33  ;;  %v2410_v32 = vrot.slane %v4098_v42, 6  ;;  %v3539_v42 = vld [vmem:[#allocation2 + $0x248] ss:$84 sps:$4 sm:$0xff]  }
 0xc65   :  { %2436 = vmatpush1.bf16.msra.mxu1 %v3985_v34  ;;  %2477 = vmatpush1.bf16.msra.mxu0 %v3987_v35 }
 0xc66   :  { %2764 = vmatprep.subr.bf16.mxu1 %v3518_v52  ;;  %2805 = vmatprep.subr.bf16.mxu0 %v3521_v48 }
 0xd1b   :  { %v2326_v61 = vpop.f32.mrb[36].mxu1  ;;  %v2367_v62 = vpop.f32.mrb[40].mxu0 }
 0xd1c   :  { %v2378_v0 = vrot.slane %v2326_v61, 4  ;;  %v2328_v1 = vpop.f32.mrb[37].mxu1  ;;  %v2369_v2 = vpop.f32.mrb[41].mxu0  ;;  %v2380_v20 = vrot.slane %v2367_v62, 4  ;;  %v3545_v61 = vld [vmem:[#allocation2 + $0x2f0] ss:$84 sps:$4 sm:$0xff]  }
 0xd1d   :  { %v2379_v51 = vrot.slane %v2328_v1, 4  ;;  %v2330_v3 = vpop.f32.mrb[38].mxu1  ;;  %v2371_v4 = vpop.f32.mrb[42].mxu0  ;;  %v2381_v15 = vrot.slane %v2369_v2, 4  ;;  %v3548_v62 = vld [vmem:[#allocation2 + $0x390] ss:$84 sps:$4 sm:$0xff]  }
 0xd1e   :  { %v2386_v5 = vadd.f32 %v2378_v0, %v4039_v45  ;;  %v2331_v6 = vpop.f32.mrb[39].mxu1  ;;  %v2372_v7 = vpop.f32.mrb[43].mxu0  ;;  %v2388_v16 = vadd.f32 %v2380_v20, %v4053_v19  ;;  %v3551_v0 = vld [vmem:[#allocation2 + $0x398] ss:$84 sps:$4 sm:$0xff]   ;;  %v3549_v2 = vld [vmem:[#allocation2 + $0x394] ss:$84 sps:$4 sm:$0xff]  }
 0xd1f   :  { %v2387_v10 = vadd.f32 %v2379_v51, %v4041_v46  ;;  %v2389_v17 = vadd.f32 %v2381_v15, %v4049_v36  ;;  %v3546_v1 = vld [vmem:[#allocation2 + $0x38c] ss:$84 sps:$4 sm:$0xff]   ;;  %v3552_v4 = vld [vmem:[#allocation2 + $0x434] ss:$84 sps:$4 sm:$0xff]  }
 0xd20   :  { %v3053_v11 = vmul.f32 -1.442695, %v2386_v5  ;;  %v3554_v51 = vld [vmem:[#allocation2 + $0x438] ss:$84 sps:$4 sm:$0xff]   ;;  %v3557_v3 = vld [vmem:[#allocation2 + $0x440] ss:$84 sps:$4 sm:$0xff]  }
 0xd21   :  { %v3054_v14 = vmul.f32 -1.442695, %v2387_v10  ;;  %v3055_v21 = vmul.f32 -1.442695, %v2389_v17  ;;  %v3555_v5 = vld [vmem:[#allocation2 + $0x43c] ss:$84 sps:$4 sm:$0xff]  }
 0xd22   :  { %3636 = vpow2.f32 %v3053_v11  ;;  %v3560_v6 = vld [vmem:[#allocation2 + $0x4e0] ss:$84 sps:$4 sm:$0xff]   ;;  %v3563_v7 = vld [vmem:[#allocation2 + $0x4e8] ss:$84 sps:$4 sm:$0xff]   ;;  %v3561_v11 = vld [vmem:[#allocation2 + $0x4e4] ss:$84 sps:$4 sm:$0xff]  }
 0xd23   :  { %3638 = vpow2.f32 %v3054_v14  ;;  %v3558_v10 = vld [vmem:[#allocation2 + $0x4dc] ss:$84 sps:$4 sm:$0xff]  }
 0xd24   :  { %3640 = vpow2.f32 %v3055_v21 }
 0xd25   :  { %3642 = vtanh.f32 %v2388_v16 }
 0xd2c   :  { %v3637_v25 = vpop.eup %3636 }
 0xd2d   :  { %v3639_v26 = vpop.eup %3638  ;;  %v2393_v27 = vadd.f32 1.0, %v3637_v25 }
 0xd2e   :  { %v2399_v28 = vadd.f32 1.0, %v3639_v26  ;;  %v3641_v29 = vpop.eup %3640 }
 0xd2f   :  { %3644 = vrcp.f32 %v2393_v27  ;;  %v3643_v30 = vpop.eup %3642  ;;  %v2406_v35 = vadd.f32 1.0, %v3641_v29 }
 0xd30   :  { %3646 = vrcp.f32 %v2399_v28 }
 0xd31   :  { %3648 = vrcp.f32 %v2406_v35 }
 0xd39   :  { %v3645_v31 = vpop.eup %3644 }
 0xd3a   :  { %v3647_v33 = vpop.eup %3646  ;;  %v2413_v34 = vmul.f32 %v3645_v31, %v3643_v30 }
 0xd3b   :  { %v2412_v37 = vmul.f32 %v3647_v33, %v2410_v32  ;;  %v3649_v53 = vpop.eup %3648 }
 0xd3d   :  { %v4138_v50 = vadd.f32 %v2413_v34, %v2412_v37 }
 0xd3f   :  { %3650 = vtanh.f32 %v4138_v50  ;;  %v2539_v48 = vrot.slane %v4138_v50, 6 }
 0xd49   :  { %v3651_v8 = vpop.eup %3650 }
 0xd4a   :  { %v2416_v9 = vmul.f32 %v3651_v8, %v3649_v53 }
 0xd4c   :  { %v2417_v40 = vpack.c.bf16 %v2416_v9, %v2416_v9 }
 0xd4e   :  { %v2419_v54 = vrot.slane %v2417_v40, 2 }
 0xd50   :  { %2454 = vmatmul.mubr.bf16.vlgmr.msra.gmra.mrb[40].mxu1 %v2419_v54  ;;  %2495 = vmatmul.mubr.bf16.vlgmr.msra.gmra.mrb[44].mxu0 %v2419_v54 }
 0xd51   :  { %2796 = vmatprep.mubr.bf16.mxu1 %v3695_v41  ;;  %2837 = vmatprep.mubr.bf16.mxu0 %v3695_v41  ;;  %v3531_v41 = vld [vmem:[#allocation2 + $0x19c] ss:$84 sps:$4 sm:$0xff]  }
 0xd52   :  { %2765 = vmatpush1.bf16.msra.mxu1 %v3516_v55  ;;  %2806 = vmatpush1.bf16.msra.mxu0 %v3519_v56 }
 0xd53   :  { %2766 = vmatprep.subr.bf16.mxu1 %v3524_v58  ;;  %2807 = vmatprep.subr.bf16.mxu0 %v3527_v59 }
 0xd56   :  { %2767 = vmatpush1.bf16.msra.mxu1 %v3522_v63  ;;  %2808 = vmatpush1.bf16.msra.mxu0 %v3525_v18 }
 0xd57   :  { %2768 = vmatprep.subr.bf16.mxu1 %v3530_v13  ;;  %2809 = vmatprep.subr.bf16.mxu0 %v3533_v38 }
 0xd5a   :  { %2769 = vmatpush1.bf16.msra.mxu1 %v3528_v39  ;;  %2810 = vmatpush1.bf16.msra.mxu0 %v3531_v41  ;;  %v2579_v39 = vld [vmem:[%s4176_s4 + $0xf] sm:$0xf] }
 0xd5b   :  { %2770 = vmatprep.subr.bf16.mxu1 %v3536_v60  ;;  %2811 = vmatprep.subr.bf16.mxu0 %v3539_v42  ;;  %v2584_v50 = vrot.slane %v2579_v39, %v3797_v24  ;;  %v2592_v41 = vrot.slane %v2579_v39, %v4047_v57  ;;  %v2850_v60 = vld [vmem:[%s4176_s4 + $0x13] sm:$0xf]  ;;  %v2588_v42 = vrot.slane %v2579_v39, %v3803_v23 }
 0xd5e   :  { %2771 = vmatpush1.bf16.msra.mxu1 %v3534_v22  ;;  %2812 = vmatpush1.bf16.msra.mxu0 %v3537_v43  ;;  %v2596_v22 = vrot.slane %v2579_v39, %v4037_v44 }
 0xd5f   :  { %2772 = vmatprep.subr.bf16.mxu1 %v3542_v47  ;;  %2813 = vmatprep.subr.bf16.mxu0 %v3545_v61 }
 0xd62   :  { %2773 = vmatpush1.bf16.msra.mxu1 %v3540_v12  ;;  %2814 = vmatpush1.bf16.msra.mxu0 %v3543_v49  ;;  %v2855_v49 = vrot.slane %v2850_v60, %v3797_v24 }
 0xd63   :  { %2774 = vmatprep.subr.bf16.mxu1 %v3548_v62  ;;  %2815 = vmatprep.subr.bf16.mxu0 %v3551_v0 }
 0xd66   :  { %2775 = vmatpush1.bf16.msra.mxu1 %v3546_v1  ;;  %2816 = vmatpush1.bf16.msra.mxu0 %v3549_v2  ;;  %v2863_v1 = vrot.slane %v2850_v60, %v4047_v57 }
 0xd67   :  { %2776 = vmatprep.subr.bf16.mxu1 %v3554_v51  ;;  %2817 = vmatprep.subr.bf16.mxu0 %v3557_v3  ;;  %v2859_v51 = vrot.slane %v2850_v60, %v3803_v23 }
 0xd6a   :  { %2777 = vmatpush1.bf16.msra.mxu1 %v3552_v4  ;;  %2818 = vmatpush1.bf16.msra.mxu0 %v3555_v5 }
 0xd6b   :  { %2778 = vmatprep.subr.bf16.mxu1 %v3560_v6  ;;  %2819 = vmatprep.subr.bf16.mxu0 %v3563_v7 }
 0xd6e   :  { %2779 = vmatpush1.bf16.msra.mxu1 %v3558_v10  ;;  %2820 = vmatpush1.bf16.msra.mxu0 %v3561_v11 }
 0xe23   :  { %v2455_v14 = vpop.f32.mrb[40].mxu1  ;;  %v2496_v15 = vpop.f32.mrb[44].mxu0 }
 0xe24   :  { %v2507_v17 = vrot.slane %v2455_v14, 2  ;;  %v2457_v20 = vpop.f32.mrb[41].mxu1  ;;  %v2498_v21 = vpop.f32.mrb[45].mxu0  ;;  %v2509_v35 = vrot.slane %v2496_v15, 2 }
 0xe25   :  { %v2508_v16 = vrot.slane %v2457_v20, 2  ;;  %v2459_v25 = vpop.f32.mrb[42].mxu1  ;;  %v2500_v26 = vpop.f32.mrb[46].mxu0  ;;  %v2510_v33 = vrot.slane %v2498_v21, 2 }
 0xe26   :  { %v2515_v27 = vadd.f32 %v2507_v17, %v4039_v45  ;;  %v2460_v28 = vpop.f32.mrb[43].mxu1  ;;  %v2501_v29 = vpop.f32.mrb[47].mxu0  ;;  %v2517_v53 = vadd.f32 %v2509_v35, %v4053_v19  ;;  %v2867_v17 = vrot.slane %v2850_v60, %v4037_v44  ;;  %v3091_v44 = vld [vmem:[%s4176_s4 + $0x17] ss:$0 sm:$0xff] }
 0xe27   :  { %v2516_v30 = vadd.f32 %v2508_v16, %v4041_v46  ;;  %v2518_v34 = vadd.f32 %v2510_v33, %v4049_v36 }
 0xe28   :  { %v3056_v31 = vmul.f32 -1.442695, %v2515_v27 }
 0xe29   :  { %v3057_v32 = vmul.f32 -1.442695, %v2516_v30  ;;  %v3058_v37 = vmul.f32 -1.442695, %v2518_v34 }
 0xe2a   :  { %3652 = vpow2.f32 %v3056_v31 }
 0xe2b   :  { %3654 = vpow2.f32 %v3057_v32 }
 0xe2c   :  { %3656 = vpow2.f32 %v3058_v37 }
 0xe2d   :  { %3658 = vtanh.f32 %v2517_v53 }
 0xe34   :  { %v3653_v8 = vpop.eup %3652 }
 0xe35   :  { %v3655_v9 = vpop.eup %3654  ;;  %v2522_v40 = vadd.f32 1.0, %v3653_v8 }
 0xe36   :  { %v2528_v45 = vadd.f32 1.0, %v3655_v9  ;;  %v3657_v46 = vpop.eup %3656 }
 0xe37   :  { %3660 = vrcp.f32 %v2522_v40  ;;  %v3659_v54 = vpop.eup %3658  ;;  %v2535_v36 = vadd.f32 1.0, %v3657_v46 }
 0xe38   :  { %3662 = vrcp.f32 %v2528_v45 }
 0xe39   :  { %3664 = vrcp.f32 %v2535_v36 }
 0xe41   :  { %v3661_v52 = vpop.eup %3660 }
 0xe42   :  { %v3663_v55 = vpop.eup %3662  ;;  %v2542_v56 = vmul.f32 %v3661_v52, %v3659_v54 }
 0xe43   :  { %v2541_v58 = vmul.f32 %v3663_v55, %v2539_v48  ;;  %v3665_v19 = vpop.eup %3664 }
 0xe45   :  { %v2543_v59 = vadd.f32 %v2542_v56, %v2541_v58 }
 0xe47   :  { %3666 = vtanh.f32 %v2543_v59 }
 0xe51   :  { %v3667_v63 = vpop.eup %3666 }
 0xe52   :  { %v2545_v18 = vmul.f32 %v3667_v63, %v3665_v19 }
 0xe54   :  { %v2546_v13 = vpack.c.bf16 %v2545_v18, %v2545_v18 }
 0xe56   :  { %v2602_v38 = vrot.slane %v2546_v13, 3 }
 0xe58   :  { %2797 = vmatmul.mubr.bf16.vlgmr.msra.gmra.mrb[44].mxu1 %v2602_v38  ;;  %2838 = vmatmul.mubr.bf16.vlgmr.msra.gmra.mrb[48].mxu0 %v2602_v38 }
 0xf2b   :  { %v2798_v43 = vpop.f32.mrb[44].mxu1  ;;  %v2839_v47 = vpop.f32.mrb[48].mxu0 }
 0xf2c   :  { %v2799_v12 = vadd.f32 %v2798_v43, %v2584_v50  ;;  %v2840_v61 = vadd.f32 %v2839_v47, %v2592_v41  ;;  %v2800_v62 = vpop.f32.mrb[45].mxu1  ;;  %v2841_v0 = vpop.f32.mrb[49].mxu0 }
 0xf2d   :  { %v2801_v2 = vadd.f32 %v2800_v62, %v2588_v42  ;;  %v2842_v3 = vadd.f32 %v2841_v0, %v2596_v22  ;;  %v2802_v4 = vpop.f32.mrb[46].mxu1  ;;  %v2843_v5 = vpop.f32.mrb[50].mxu0 }
 0xf2e   :  { %v2846_v6 = vmax.f32 %v2799_v12, 0.0  ;;  %v2848_v7 = vmax.f32 %v2840_v61, 0.0  ;;  %v2803_v10 = vpop.f32.mrb[47].mxu1  ;;  %v2844_v11 = vpop.f32.mrb[51].mxu0 }
 0xf2f   :  { %v2847_v14 = vmax.f32 %v2801_v2, 0.0  ;;  %v2849_v15 = vmax.f32 %v2842_v3, 0.0 }
 0xf30   :  { %v2872_v24 = vmul.f32 %v2855_v49, %v2846_v6  ;;  %v2874_v20 = vmul.f32 %v2863_v1, %v2848_v7 }
 0xf31   :  { %v2873_v21 = vmul.f32 %v2859_v51, %v2847_v14  ;;  %v2875_v25 = vmul.f32 %v2867_v17, %v2849_v15 }
 0xf32   :  { %v2876_v16 = vsel %vm1554_vm13, %v2872_v24, 0.0  ;;  %v2879_v26 = vsel %vm1554_vm13, %v2874_v20, 0.0 }
 0xf33   :  { %v2877_v57 = vsel %vm1554_vm13, %v2873_v21, 0.0  ;;  %v2881_v28 = vsel %vm1554_vm13, %v2875_v25, 0.0 }
 0xf34   :  { %v2878_v23 = vadd.f32 %v2877_v57, %v2876_v16 }
 0xf36   :  { %v2880_v27 = vadd.f32 %v2879_v26, %v2878_v23 }
 0xf38   :  { %v2882_v29 = vadd.f32 %v2881_v28, %v2880_v27 }
 0xf3a   :  { %2883 = vadd.xlane.f32.xlu0 %v2882_v29 }
 0xfc7   :  { %v2884_v30 = vpop.xlane.xlu0 %2883 }
 0xfc8   :  { %v2892_v31 = vadd.f32 %v3091_v44, %v2884_v30 }
 0xfca   :  { %2894 = vst.msk [vmem:[%s4177_s5] sm:$0x3] %vm2893_vm0, %v2892_v31 }
 0xfcb   :  { %2899 = vsyncpa [#allocation3], 1 }

</bundles_post_ra>
